<compile_context>
chip_gen: v5e
topology: v5e:2x2
jax: 0.10.0
libtpu: 0.0.40
codegen_flags: <defaults>
</compile_context>

<pallas_src>
import functools
import numpy as np

import jax
import jax.numpy as jnp
from jax.experimental import pallas as pl
from jax.experimental.pallas import tpu as pltpu

_EPS = 1e-5
_NP = 128      # lane-padded l2 output features per complex part (lane-dense stores)
_TK = 256      # K-tile (w1 rows per grid step); fills v6e/v7x MXU depth
_NJ = 2        # output-feature blocks ("parallel" axis -> 2 TensorCores on v7x)


# ------------------------------ fused kernel ------------------------------- #

def _fused_kernel(xin_ref, pb_ref, convw_ref, convbn_ref, w1_ref, b1_ref,
                  w2_ref, out_ref, lhs_s, acc_s, *, B, S, OC, H1B, TK):
    k = pl.program_id(1)
    nk = pl.num_programs(1)
    BS = B * S

    # ---- front end (once per feature block j): pool -> 1x1 conv -> BN -> ReLU,
    #      then pack the l1 LHS into a persistent bf16 VMEM scratch. ----
    @pl.when(k == 0)
    def _():
        # CAvgPool2d(5, 3): batch-block-diagonal pooling matmul, one dot per part.
        pr = jnp.dot(pb_ref[...], xin_ref[0],
                     preferred_element_type=jnp.float32)            # (BS, C) rows (s, b)
        pi = jnp.dot(pb_ref[...], xin_ref[1],
                     preferred_element_type=jnp.float32)
        xp = jnp.concatenate([pr, pi], axis=0)                      # (2BS, C) rows (part, s, b)

        # 1x1 CConv2d: row-stacked [real; imag] lhs x column-concatenated [Wr | Wi],
        # so each conv weight is pushed through the MXU exactly once.
        pc = jnp.dot(xp, convw_ref[...],
                     preferred_element_type=jnp.float32)            # (2BS, 2*OC)
        cr = pc[:BS, :OC] - pc[BS:, OC:]                            # real conv output
        ci = pc[:BS, OC:] + pc[BS:, :OC]                            # imag conv output
        # CBatchnorm (eval mode; conv bias folded into the shift) + ReLU.
        yr = jnp.maximum(cr * convbn_ref[0:1, :] + convbn_ref[1:2, :], 0.0)  # (BS, OC)
        yi = jnp.maximum(ci * convbn_ref[2:3, :] + convbn_ref[3:4, :], 0.0)  # rows (s, b)

        # Pack the flatten once: rows (part, b), columns ordered (s, c) to match
        # the s-major row-permuted w1.  Lane-concat of 16 OC-wide pieces per part.
        lr = jnp.concatenate([yr[s * B:(s + 1) * B, :] for s in range(S)], axis=1)
        li = jnp.concatenate([yi[s * B:(s + 1) * B, :] for s in range(S)], axis=1)
        lhs_s[...] = jnp.concatenate([lr, li], axis=0).astype(jnp.bfloat16)  # (2B, S*OC)
        acc_s[...] = jnp.zeros_like(acc_s)

    # ---- CLinear(2048, 1024): K-tiled bf16 matmul, f32 VMEM accumulator.
    #      w1_ref is the (TK, 2*H1B) tile [W1r_j | W1i_j] for reduction chunk k. ----
    kk = pl.multiple_of(k * TK, TK)
    acc_s[...] += jnp.dot(lhs_s[:, pl.ds(kk, TK)], w1_ref[...],
                          preferred_element_type=jnp.float32)       # (2B, 2*H1B)

    # ---- epilogue (last reduction chunk): l1 bias + ReLU, then this feature
    #      block's partial CLinear(1024, num_classes) product. ----
    @pl.when(k == nk - 1)
    def _():
        p1 = acc_s[...]
        hr = jnp.maximum(p1[:B, :H1B] - p1[B:, H1B:] + b1_ref[0:1, :], 0.0)
        hi = jnp.maximum(p1[:B, H1B:] + p1[B:, :H1B] + b1_ref[1:2, :], 0.0)
        # Dropout(p=0.7): identity in eval mode.
        hs = jnp.concatenate([hr, hi], axis=0)                       # (2B, H1B) f32
        out_ref[...] = jnp.dot(hs, w2_ref[...],
                               preferred_element_type=jnp.float32)   # (2B, 2*NP)


# ------------------------------- parameters -------------------------------- #

def init_params(key, in_channels, num_classes):
    """PyTorch-layout parameters (used directly by the pure-JAX reference)."""
    OC = 128
    ks = jax.random.split(key, 20)
    p = {}
    # CConv2d(in_channels, 128, kernel_size=1): real conv + imag conv (with bias).
    p["conv_wr"] = 0.1 * jax.random.normal(ks[0], (OC, in_channels), jnp.float32)
    p["conv_wi"] = 0.1 * jax.random.normal(ks[1], (OC, in_channels), jnp.float32)
    p["conv_br"] = 0.05 * jax.random.normal(ks[2], (OC,), jnp.float32)
    p["conv_bi"] = 0.05 * jax.random.normal(ks[3], (OC,), jnp.float32)
    # CBatchnorm(128): two independent BatchNorm2d (real / imag), eval-mode stats.
    p["bn_gamma_r"] = 1.0 + 0.1 * jax.random.normal(ks[4], (OC,), jnp.float32)
    p["bn_beta_r"] = 0.1 * jax.random.normal(ks[5], (OC,), jnp.float32)
    p["bn_mean_r"] = 0.1 * jax.random.normal(ks[6], (OC,), jnp.float32)
    p["bn_var_r"] = 1.0 + 0.1 * jnp.abs(jax.random.normal(ks[7], (OC,), jnp.float32))
    p["bn_gamma_i"] = 1.0 + 0.1 * jax.random.normal(ks[8], (OC,), jnp.float32)
    p["bn_beta_i"] = 0.1 * jax.random.normal(ks[9], (OC,), jnp.float32)
    p["bn_mean_i"] = 0.1 * jax.random.normal(ks[10], (OC,), jnp.float32)
    p["bn_var_i"] = 1.0 + 0.1 * jnp.abs(jax.random.normal(ks[11], (OC,), jnp.float32))
    # CLinear(2048, 1024), weights stored pre-transposed as [in_features, out_features].
    p["l1_wr"] = 0.05 * jax.random.normal(ks[12], (2048, 1024), jnp.float32)
    p["l1_wi"] = 0.05 * jax.random.normal(ks[13], (2048, 1024), jnp.float32)
    p["l1_br"] = 0.05 * jax.random.normal(ks[14], (1024,), jnp.float32)
    p["l1_bi"] = 0.05 * jax.random.normal(ks[15], (1024,), jnp.float32)
    # CLinear(1024, num_classes)
    p["l2_wr"] = 0.1 * jax.random.normal(ks[16], (1024, num_classes), jnp.float32)
    p["l2_wi"] = 0.1 * jax.random.normal(ks[17], (1024, num_classes), jnp.float32)
    p["l2_br"] = 0.05 * jax.random.normal(ks[18], (num_classes,), jnp.float32)
    p["l2_bi"] = 0.05 * jax.random.normal(ks[19], (num_classes,), jnp.float32)
    return p


def prepare_params(p, num_classes):
    """One-time conversion into kernel-ready tensors (bf16 w1, fused BN, s-major
    row permutation, per-feature-block column concatenation, lane padding)."""
    OC = p["conv_wr"].shape[0]
    K1, H1 = p["l1_wr"].shape
    S = K1 // OC
    H1B = H1 // _NJ
    NP = _NP
    nc = num_classes
    assert H1 % _NJ == 0 and nc <= NP

    # CBatchnorm eval-mode scale/shift, with the conv bias (br -/+ bi) folded in.
    sr = p["bn_gamma_r"] / jnp.sqrt(p["bn_var_r"] + _EPS)
    tr = p["bn_beta_r"] - p["bn_mean_r"] * sr
    si = p["bn_gamma_i"] / jnp.sqrt(p["bn_var_i"] + _EPS)
    ti = p["bn_beta_i"] - p["bn_mean_i"] * si
    convbn = jnp.stack([sr, (p["conv_br"] - p["conv_bi"]) * sr + tr,
                        si, (p["conv_br"] + p["conv_bi"]) * si + ti], axis=0)   # (4, OC)
    convw = jnp.concatenate([p["conv_wr"].T, p["conv_wi"].T], axis=1)           # (C, 2*OC)

    def perm(w):  # reorder rows from PyTorch's (c, s) flatten (c*S+s) to s*OC+c
        return w.reshape(OC, S, H1).transpose(1, 0, 2).reshape(S * OC, H1)

    w1r, w1i = perm(p["l1_wr"]), perm(p["l1_wi"])
    # NJ output-feature blocks, each block j = [W1r_j | W1i_j]  ->  (S*OC, NJ*2*H1B)
    w1cat = jnp.concatenate(
        [jnp.concatenate([w1r[:, j * H1B:(j + 1) * H1B],
                          w1i[:, j * H1B:(j + 1) * H1B]], axis=1)
         for j in range(_NJ)], axis=1).astype(jnp.bfloat16)
    b1 = jnp.stack([p["l1_br"] - p["l1_bi"], p["l1_br"] + p["l1_bi"]], axis=0)  # (2, H1)

    # l2 weights lane-padded to NP output columns per part; kept in f32 (tiny).
    w2r = jnp.zeros((H1, NP), jnp.float32).at[:, :nc].set(p["l2_wr"])
    w2i = jnp.zeros((H1, NP), jnp.float32).at[:, :nc].set(p["l2_wi"])
    w2cat = jnp.concatenate([w2r, w2i], axis=1)                                 # (H1, 2*NP)
    b2 = jnp.stack([p["l2_br"] - p["l2_bi"], p["l2_br"] + p["l2_bi"]], axis=0)  # (2, nc)

    return {"convw": convw, "convbn": convbn, "w1cat": w1cat, "b1": b1,
            "w2cat": w2cat, "b2": b2}


# -------------------------------- forward ---------------------------------- #

def complex_inception_aux_forward(x, kp, num_classes):
    B, C, H, W, _ = x.shape
    KS, ST = 5, 3
    OH = (H - KS) // ST + 1
    OW = (W - KS) // ST + 1
    S = OH * OW
    HW = H * W
    OC = kp["convbn"].shape[1]
    H1 = kp["b1"].shape[1]
    NP = _NP
    NJ, TK = _NJ, _TK
    H1B = H1 // NJ
    K1 = S * OC
    assert K1 == kp["w1cat"].shape[0], "CLinear(2048, .) requires a 4x4 pooled map"
    assert K1 % TK == 0
    KT = K1 // TK

    # CAvgPool2d(5, 3) as a batch-block-diagonal pooling matrix (built at trace time):
    #   rows ordered (s, b), cols ordered (b, h, w).
    pmat = np.zeros((HW, S), np.float32)
    for oh in range(OH):
        for ow in range(OW):
            for kh in range(KS):
                for kw in range(KS):
                    pmat[(ST * oh + kh) * W + (ST * ow + kw), oh * OW + ow] = 1.0 / (KS * KS)
    pb = np.zeros((B * S, B * HW), np.float32)
    for b in range(B):
        pb[b::B, b * HW:(b + 1) * HW] = pmat.T
    pb = jnp.asarray(pb)

    # Input rearranged once (tiny, ~12 KB): (part, b*h*w, channel).
    xin = jnp.transpose(x, (4, 0, 2, 3, 1)).reshape(2, B * HW, C)

    kern = functools.partial(_fused_kernel, B=B, S=S, OC=OC, H1B=H1B, TK=TK)
    flops = 2 * (2 * B) * K1 * (2 * H1) + 2 * (2 * B) * H1 * (2 * NP)
    bytes_accessed = (kp["w1cat"].size * 2 + kp["w2cat"].size * 4
                      + pb.size * 4 + xin.size * 4 + NJ * 2 * B * 2 * NP * 4)

    out = pl.pallas_call(
        kern,
        out_shape=jax.ShapeDtypeStruct((NJ, 2 * B, 2 * NP), jnp.float32),
        grid_spec=pltpu.PrefetchScalarGridSpec(
            num_scalar_prefetch=0,
            grid=(NJ, KT),                                   # (feature block, K chunk)
            in_specs=[
                pl.BlockSpec((2, B * HW, C), lambda j, k: (0, 0, 0)),   # input (resident)
                pl.BlockSpec((B * S, B * HW), lambda j, k: (0, 0)),     # pooling matrix
                pl.BlockSpec((C, 2 * OC), lambda j, k: (0, 0)),         # conv [Wr | Wi]
                pl.BlockSpec((4, OC), lambda j, k: (0, 0)),             # fused BN scale/shift
                pl.BlockSpec((TK, 2 * H1B), lambda j, k: (k, j)),       # w1 K x feature tile
                pl.BlockSpec((2, H1B), lambda j, k: (0, j)),            # l1 bias block
                pl.BlockSpec((H1B, 2 * NP), lambda j, k: (j, 0)),       # w2 row block
            ],
            out_specs=pl.BlockSpec((None, 2 * B, 2 * NP), lambda j, k: (j, 0, 0)),
            scratch_shapes=[pltpu.VMEM((2 * B, S * OC), jnp.bfloat16),  # packed l1 LHS
                            pltpu.VMEM((2 * B, 2 * H1B), jnp.float32)]),  # l1 accumulator
        compiler_params=pltpu.CompilerParams(
            dimension_semantics=("parallel", "arbitrary")),
        cost_estimate=pl.CostEstimate(flops=flops, transcendentals=0,
                                      bytes_accessed=bytes_accessed),
    )(xin, pb, kp["convw"], kp["convbn"], kp["w1cat"], kp["b1"], kp["w2cat"])

    # Tiny wrapper epilogue: sum per-feature-block partial l2 products, recombine
    # complex quadrants, add the l2 bias, slice off the lane padding.
    nc = num_classes
    p2 = out.sum(axis=0)                                         # (2B, 2*NP)
    out_r = p2[:B, :nc] - p2[B:, NP:NP + nc] + kp["b2"][0:1, :]
    out_i = p2[:B, NP:NP + nc] + p2[B:, :nc] + kp["b2"][1:2, :]
    return jnp.stack([out_r, out_i], axis=-1)


# --------------------------- pure-JAX reference ----------------------------- #

def _reference_forward(x, params):
    xr, xi = x[..., 0], x[..., 1]
    B, C, H, W = xr.shape

    def pool(a):
        rows = []
        for oh in range((H - 5) // 3 + 1):
            cols = []
            for ow in range((W - 5) // 3 + 1):
                cols.append(a[:, :, 3 * oh:3 * oh + 5, 3 * ow:3 * ow + 5].mean(axis=(2, 3)))
            rows.append(jnp.stack(cols, axis=-1))
        return jnp.stack(rows, axis=-2)

    pr, pi = pool(xr), pool(xi)

    def conv(a, w, b):
        return jnp.einsum('bchw,oc->bohw', a, w) + b[None, :, None, None]

    cr = conv(pr, params["conv_wr"], params["conv_br"]) - conv(pi, params["conv_wi"], params["conv_bi"])
    ci = conv(pr, params["conv_wi"], params["conv_bi"]) + conv(pi, params["conv_wr"], params["conv_br"])

    def bn(a, g, bta, m, v):
        return (g[None, :, None, None] * (a - m[None, :, None, None])
                / jnp.sqrt(v[None, :, None, None] + _EPS) + bta[None, :, None, None])

    cr = jnp.maximum(bn(cr, params["bn_gamma_r"], params["bn_beta_r"],
                        params["bn_mean_r"], params["bn_var_r"]), 0.0)
    ci = jnp.maximum(bn(ci, params["bn_gamma_i"], params["bn_beta_i"],
                        params["bn_mean_i"], params["bn_var_i"]), 0.0)
    fr, fi = cr.reshape(B, -1), ci.reshape(B, -1)

    def clin(ar, ai, wr, wi, br, bi):
        yr = (ar @ wr + br) - (ai @ wi + bi)
        yi = (ar @ wi + bi) + (ai @ wr + br)
        return yr, yi

    hr, hi = clin(fr, fi, params["l1_wr"], params["l1_wi"], params["l1_br"], params["l1_bi"])
    hr, hi = jnp.maximum(hr, 0.0), jnp.maximum(hi, 0.0)
    or_, oi_ = clin(hr, hi, params["l2_wr"], params["l2_wi"], params["l2_br"], params["l2_bi"])
    return jnp.stack([or_, oi_], axis=-1)


# ---------------------------------- main ------------------------------------ #

if __name__ == "__main__":
    # Spatial size must satisfy 128 * OH * OW == 2048 (CLinear(2048, ...)),
    # i.e. a 4x4 pooled map -> 14x14 input (standard GoogLeNet aux geometry).
    B, C, H, W = 2, 4, 14, 14
    num_classes = 10

    key = jax.random.PRNGKey(0)
    kx, kprm = jax.random.split(key)
    x = jax.random.normal(kx, (B, C, H, W, 2), jnp.float32)
    params = init_params(kprm, C, num_classes)
    kparams = prepare_params(params, num_classes)   # one-time, outside jit

    fwd = jax.jit(functools.partial(complex_inception_aux_forward,
                                    num_classes=num_classes))
    out = jax.block_until_ready(fwd(x, kparams))
    assert out.shape == (B, num_classes, 2), out.shape

    ref = _reference_forward(x, params)
    # 2e-2 tolerance accommodates the bf16 w1 weights / l1 activations.
    np.testing.assert_allclose(np.asarray(out), np.asarray(ref), rtol=2e-2, atol=2e-2)

    print("KERNEL_OK")
</pallas_src>

<mosaic_0001>
module attributes {stable_mosaic.version = 11 : i64} {
  func.func @_fused_kernel(%arg0: i32, %arg1: i32, %arg2: memref<2x392x4xf32, #tpu.memory_space<vmem>>, %arg3: memref<32x392xf32, #tpu.memory_space<vmem>>, %arg4: memref<4x256xf32, #tpu.memory_space<vmem>>, %arg5: memref<4x128xf32, #tpu.memory_space<vmem>>, %arg6: memref<256x1024xbf16, #tpu.memory_space<vmem>>, %arg7: memref<2x512xf32, #tpu.memory_space<vmem>>, %arg8: memref<512x256xf32, #tpu.memory_space<vmem>>, %arg9: memref<1x4x256xf32, #tpu.memory_space<vmem>>, %arg10: memref<4x2048xbf16, #tpu.memory_space<vmem>>, %arg11: memref<4x1024xf32, #tpu.memory_space<vmem>>) attributes {dimension_semantics = [#tpu.dimension_semantics<parallel>, #tpu.dimension_semantics<arbitrary>], iteration_bounds = array<i64: 2, 8>, scalar_prefetch = 0 : i64, scratch_operands = 2 : i64, tpu.core_type = #tpu.core_type<tc>, window_params = [{pipeline_mode = #tpu.pipeline_mode<synchronous>, transform_indices = @transform_0, window_bounds = array<i64: 2, 392, 4>}, {pipeline_mode = #tpu.pipeline_mode<synchronous>, transform_indices = @transform_1, window_bounds = array<i64: 32, 392>}, {pipeline_mode = #tpu.pipeline_mode<synchronous>, transform_indices = @transform_2, window_bounds = array<i64: 4, 256>}, {pipeline_mode = #tpu.pipeline_mode<synchronous>, transform_indices = @transform_3, window_bounds = array<i64: 4, 128>}, {transform_indices = @transform_4, window_bounds = array<i64: 256, 1024>}, {transform_indices = @transform_5, window_bounds = array<i64: 2, 512>}, {transform_indices = @transform_6, window_bounds = array<i64: 512, 256>}, {transform_indices = @transform_7, window_bounds = array<i64: 1, 4, 256>}]} {
    %c0_i32 = arith.constant 0 : i32
    %0 = arith.cmpi eq, %arg1, %c0_i32 : i32
    %1 = arith.extui %0 : i1 to i32
    %c0_i32_0 = arith.constant 0 : i32
    %2 = arith.cmpi ne, %1, %c0_i32_0 : i32
    scf.if %2 {
      %c0_8 = arith.constant 0 : index
      %c0_9 = arith.constant 0 : index
      %15 = vector.load %arg3[%c0_8, %c0_9] : memref<32x392xf32, #tpu.memory_space<vmem>>, vector<32x392xf32>
      %c0_10 = arith.constant 0 : index
      %c0_11 = arith.constant 0 : index
      %c0_12 = arith.constant 0 : index
      %16 = vector.load %arg2[%c0_10, %c0_11, %c0_12] : memref<2x392x4xf32, #tpu.memory_space<vmem>>, vector<1x392x4xf32>
      %17 = vector.shape_cast %16 : vector<1x392x4xf32> to vector<392x4xf32>
      %cst_13 = arith.constant dense<0.000000e+00> : vector<32x4xf32>
      %18 = tpu.matmul %15, %17, %cst_13 {dimension_numbers = #tpu.dot_dimension_numbers<[1], [0], [0], [1], [0, 0, 1, 1], [], []>} : vector<32x392xf32>, vector<392x4xf32>, vector<32x4xf32> -> vector<32x4xf32>
      %c0_14 = arith.constant 0 : index
      %c0_15 = arith.constant 0 : index
      %19 = vector.load %arg3[%c0_14, %c0_15] : memref<32x392xf32, #tpu.memory_space<vmem>>, vector<32x392xf32>
      %c1 = arith.constant 1 : index
      %c0_16 = arith.constant 0 : index
      %c0_17 = arith.constant 0 : index
      %20 = vector.load %arg2[%c1, %c0_16, %c0_17] : memref<2x392x4xf32, #tpu.memory_space<vmem>>, vector<1x392x4xf32>
      %21 = vector.shape_cast %20 : vector<1x392x4xf32> to vector<392x4xf32>
      %cst_18 = arith.constant dense<0.000000e+00> : vector<32x4xf32>
      %22 = tpu.matmul %19, %21, %cst_18 {dimension_numbers = #tpu.dot_dimension_numbers<[1], [0], [0], [1], [0, 0, 1, 1], [], []>} : vector<32x392xf32>, vector<392x4xf32>, vector<32x4xf32> -> vector<32x4xf32>
      %23 = tpu.concatenate %18, %22 in 0 : vector<32x4xf32>, vector<32x4xf32> -> vector<64x4xf32>
      %c0_19 = arith.constant 0 : index
      %c0_20 = arith.constant 0 : index
      %24 = vector.load %arg4[%c0_19, %c0_20] : memref<4x256xf32, #tpu.memory_space<vmem>>, vector<4x256xf32>
      %cst_21 = arith.constant dense<0.000000e+00> : vector<64x256xf32>
      %25 = tpu.matmul %23, %24, %cst_21 {dimension_numbers = #tpu.dot_dimension_numbers<[1], [0], [0], [1], [0, 0, 1, 1], [], []>} : vector<64x4xf32>, vector<4x256xf32>, vector<64x256xf32> -> vector<64x256xf32>
      %26 = vector.extract_strided_slice %25 {offsets = [0, 0], sizes = [32, 128], strides = [1, 1]} : vector<64x256xf32> to vector<32x128xf32>
      %27 = vector.extract_strided_slice %25 {offsets = [32, 128], sizes = [32, 128], strides = [1, 1]} : vector<64x256xf32> to vector<32x128xf32>
      %28 = arith.subf %26, %27 : vector<32x128xf32>
      %29 = vector.extract_strided_slice %25 {offsets = [0, 128], sizes = [32, 128], strides = [1, 1]} : vector<64x256xf32> to vector<32x128xf32>
      %30 = vector.extract_strided_slice %25 {offsets = [32, 0], sizes = [32, 128], strides = [1, 1]} : vector<64x256xf32> to vector<32x128xf32>
      %31 = arith.addf %29, %30 : vector<32x128xf32>
      %c0_22 = arith.constant 0 : index
      %c0_23 = arith.constant 0 : index
      %32 = vector.load %arg5[%c0_22, %c0_23] : memref<4x128xf32, #tpu.memory_space<vmem>>, vector<1x128xf32>
      %33 = vector.broadcast %32 : vector<1x128xf32> to vector<32x128xf32>
      %34 = arith.mulf %28, %33 : vector<32x128xf32>
      %c1_24 = arith.constant 1 : index
      %c0_25 = arith.constant 0 : index
      %35 = vector.load %arg5[%c1_24, %c0_25] : memref<4x128xf32, #tpu.memory_space<vmem>>, vector<1x128xf32>
      %36 = vector.broadcast %35 : vector<1x128xf32> to vector<32x128xf32>
      %37 = arith.addf %34, %36 : vector<32x128xf32>
      %cst_26 = arith.constant 0.000000e+00 : f32
      %38 = vector.broadcast %cst_26 : f32 to vector<32x128xf32>
      %39 = arith.maximumf %37, %38 : vector<32x128xf32>
      %c2 = arith.constant 2 : index
      %c0_27 = arith.constant 0 : index
      %40 = vector.load %arg5[%c2, %c0_27] : memref<4x128xf32, #tpu.memory_space<vmem>>, vector<1x128xf32>
      %41 = vector.broadcast %40 : vector<1x128xf32> to vector<32x128xf32>
      %42 = arith.mulf %31, %41 : vector<32x128xf32>
      %c3 = arith.constant 3 : index
      %c0_28 = arith.constant 0 : index
      %43 = vector.load %arg5[%c3, %c0_28] : memref<4x128xf32, #tpu.memory_space<vmem>>, vector<1x128xf32>
      %44 = vector.broadcast %43 : vector<1x128xf32> to vector<32x128xf32>
      %45 = arith.addf %42, %44 : vector<32x128xf32>
      %cst_29 = arith.constant 0.000000e+00 : f32
      %46 = vector.broadcast %cst_29 : f32 to vector<32x128xf32>
      %47 = arith.maximumf %45, %46 : vector<32x128xf32>
      %48 = vector.extract_strided_slice %39 {offsets = [0, 0], sizes = [2, 128], strides = [1, 1]} : vector<32x128xf32> to vector<2x128xf32>
      %49 = vector.extract_strided_slice %39 {offsets = [2, 0], sizes = [2, 128], strides = [1, 1]} : vector<32x128xf32> to vector<2x128xf32>
      %50 = vector.extract_strided_slice %39 {offsets = [4, 0], sizes = [2, 128], strides = [1, 1]} : vector<32x128xf32> to vector<2x128xf32>
      %51 = vector.extract_strided_slice %39 {offsets = [6, 0], sizes = [2, 128], strides = [1, 1]} : vector<32x128xf32> to vector<2x128xf32>
      %52 = vector.extract_strided_slice %39 {offsets = [8, 0], sizes = [2, 128], strides = [1, 1]} : vector<32x128xf32> to vector<2x128xf32>
      %53 = vector.extract_strided_slice %39 {offsets = [10, 0], sizes = [2, 128], strides = [1, 1]} : vector<32x128xf32> to vector<2x128xf32>
      %54 = vector.extract_strided_slice %39 {offsets = [12, 0], sizes = [2, 128], strides = [1, 1]} : vector<32x128xf32> to vector<2x128xf32>
      %55 = vector.extract_strided_slice %39 {offsets = [14, 0], sizes = [2, 128], strides = [1, 1]} : vector<32x128xf32> to vector<2x128xf32>
      %56 = vector.extract_strided_slice %39 {offsets = [16, 0], sizes = [2, 128], strides = [1, 1]} : vector<32x128xf32> to vector<2x128xf32>
      %57 = vector.extract_strided_slice %39 {offsets = [18, 0], sizes = [2, 128], strides = [1, 1]} : vector<32x128xf32> to vector<2x128xf32>
      %58 = vector.extract_strided_slice %39 {offsets = [20, 0], sizes = [2, 128], strides = [1, 1]} : vector<32x128xf32> to vector<2x128xf32>
      %59 = vector.extract_strided_slice %39 {offsets = [22, 0], sizes = [2, 128], strides = [1, 1]} : vector<32x128xf32> to vector<2x128xf32>
      %60 = vector.extract_strided_slice %39 {offsets = [24, 0], sizes = [2, 128], strides = [1, 1]} : vector<32x128xf32> to vector<2x128xf32>
      %61 = vector.extract_strided_slice %39 {offsets = [26, 0], sizes = [2, 128], strides = [1, 1]} : vector<32x128xf32> to vector<2x128xf32>
      %62 = vector.extract_strided_slice %39 {offsets = [28, 0], sizes = [2, 128], strides = [1, 1]} : vector<32x128xf32> to vector<2x128xf32>
      %63 = vector.extract_strided_slice %39 {offsets = [30, 0], sizes = [2, 128], strides = [1, 1]} : vector<32x128xf32> to vector<2x128xf32>
      %64 = tpu.concatenate %48, %49, %50, %51, %52, %53, %54, %55, %56, %57, %58, %59, %60, %61, %62, %63 in 1 : vector<2x128xf32>, vector<2x128xf32>, vector<2x128xf32>, vector<2x128xf32>, vector<2x128xf32>, vector<2x128xf32>, vector<2x128xf32>, vector<2x128xf32>, vector<2x128xf32>, vector<2x128xf32>, vector<2x128xf32>, vector<2x128xf32>, vector<2x128xf32>, vector<2x128xf32>, vector<2x128xf32>, vector<2x128xf32> -> vector<2x2048xf32>
      %65 = vector.extract_strided_slice %47 {offsets = [0, 0], sizes = [2, 128], strides = [1, 1]} : vector<32x128xf32> to vector<2x128xf32>
      %66 = vector.extract_strided_slice %47 {offsets = [2, 0], sizes = [2, 128], strides = [1, 1]} : vector<32x128xf32> to vector<2x128xf32>
      %67 = vector.extract_strided_slice %47 {offsets = [4, 0], sizes = [2, 128], strides = [1, 1]} : vector<32x128xf32> to vector<2x128xf32>
      %68 = vector.extract_strided_slice %47 {offsets = [6, 0], sizes = [2, 128], strides = [1, 1]} : vector<32x128xf32> to vector<2x128xf32>
      %69 = vector.extract_strided_slice %47 {offsets = [8, 0], sizes = [2, 128], strides = [1, 1]} : vector<32x128xf32> to vector<2x128xf32>
      %70 = vector.extract_strided_slice %47 {offsets = [10, 0], sizes = [2, 128], strides = [1, 1]} : vector<32x128xf32> to vector<2x128xf32>
      %71 = vector.extract_strided_slice %47 {offsets = [12, 0], sizes = [2, 128], strides = [1, 1]} : vector<32x128xf32> to vector<2x128xf32>
      %72 = vector.extract_strided_slice %47 {offsets = [14, 0], sizes = [2, 128], strides = [1, 1]} : vector<32x128xf32> to vector<2x128xf32>
      %73 = vector.extract_strided_slice %47 {offsets = [16, 0], sizes = [2, 128], strides = [1, 1]} : vector<32x128xf32> to vector<2x128xf32>
      %74 = vector.extract_strided_slice %47 {offsets = [18, 0], sizes = [2, 128], strides = [1, 1]} : vector<32x128xf32> to vector<2x128xf32>
      %75 = vector.extract_strided_slice %47 {offsets = [20, 0], sizes = [2, 128], strides = [1, 1]} : vector<32x128xf32> to vector<2x128xf32>
      %76 = vector.extract_strided_slice %47 {offsets = [22, 0], sizes = [2, 128], strides = [1, 1]} : vector<32x128xf32> to vector<2x128xf32>
      %77 = vector.extract_strided_slice %47 {offsets = [24, 0], sizes = [2, 128], strides = [1, 1]} : vector<32x128xf32> to vector<2x128xf32>
      %78 = vector.extract_strided_slice %47 {offsets = [26, 0], sizes = [2, 128], strides = [1, 1]} : vector<32x128xf32> to vector<2x128xf32>
      %79 = vector.extract_strided_slice %47 {offsets = [28, 0], sizes = [2, 128], strides = [1, 1]} : vector<32x128xf32> to vector<2x128xf32>
      %80 = vector.extract_strided_slice %47 {offsets = [30, 0], sizes = [2, 128], strides = [1, 1]} : vector<32x128xf32> to vector<2x128xf32>
      %81 = tpu.concatenate %65, %66, %67, %68, %69, %70, %71, %72, %73, %74, %75, %76, %77, %78, %79, %80 in 1 : vector<2x128xf32>, vector<2x128xf32>, vector<2x128xf32>, vector<2x128xf32>, vector<2x128xf32>, vector<2x128xf32>, vector<2x128xf32>, vector<2x128xf32>, vector<2x128xf32>, vector<2x128xf32>, vector<2x128xf32>, vector<2x128xf32>, vector<2x128xf32>, vector<2x128xf32>, vector<2x128xf32>, vector<2x128xf32> -> vector<2x2048xf32>
      %82 = tpu.concatenate %64, %81 in 0 : vector<2x2048xf32>, vector<2x2048xf32> -> vector<4x2048xf32>
      %83 = arith.truncf %82 : vector<4x2048xf32> to vector<4x2048xbf16>
      %c0_30 = arith.constant 0 : index
      %c0_31 = arith.constant 0 : index
      %84 = vector.load %arg10[%c0_30, %c0_31] : memref<4x2048xbf16, #tpu.memory_space<vmem>>, vector<4x2048xbf16>
      tpu.vector_store %arg10[%c0_30, %c0_31], %83 {strides = array<i32>} : memref<4x2048xbf16, #tpu.memory_space<vmem>>, vector<4x2048xbf16>,
      %cst_32 = arith.constant 0.000000e+00 : f32
      %85 = vector.broadcast %cst_32 : f32 to vector<4x1024xf32>
      %c0_33 = arith.constant 0 : index
      %c0_34 = arith.constant 0 : index
      %86 = vector.load %arg11[%c0_33, %c0_34] : memref<4x1024xf32, #tpu.memory_space<vmem>>, vector<4x1024xf32>
      tpu.vector_store %arg11[%c0_33, %c0_34], %85 {strides = array<i32>} : memref<4x1024xf32, #tpu.memory_space<vmem>>, vector<4x1024xf32>,
    } else {
    }
    %c256_i32 = arith.constant 256 : i32
    %3 = arith.muli %arg1, %c256_i32 : i32
    %4 = tpu.assume_multiple %3, 256 : i32
    %c0 = arith.constant 0 : index
    %c0_1 = arith.constant 0 : index
    %5 = vector.load %arg11[%c0, %c0_1] : memref<4x1024xf32, #tpu.memory_space<vmem>>, vector<4x1024xf32>
    %c0_2 = arith.constant 0 : index
    %6 = arith.index_cast %4 : i32 to index
    %7 = vector.load %arg10[%c0_2, %6] : memref<4x2048xbf16, #tpu.memory_space<vmem>>, vector<4x256xbf16>
    %c0_3 = arith.constant 0 : index
    %c0_4 = arith.constant 0 : index
    %8 = vector.load %arg6[%c0_3, %c0_4] : memref<256x1024xbf16, #tpu.memory_space<vmem>>, vector<256x1024xbf16>
    %cst = arith.constant dense<0.000000e+00> : vector<4x1024xf32>
    %9 = tpu.matmul %7, %8, %cst {dimension_numbers = #tpu.dot_dimension_numbers<[1], [0], [0], [1], [0, 0, 1, 1], [], []>} : vector<4x256xbf16>, vector<256x1024xbf16>, vector<4x1024xf32> -> vector<4x1024xf32>
    %10 = arith.addf %5, %9 : vector<4x1024xf32>
    %c0_5 = arith.constant 0 : index
    %c0_6 = arith.constant 0 : index
    %11 = vector.load %arg11[%c0_5, %c0_6] : memref<4x1024xf32, #tpu.memory_space<vmem>>, vector<4x1024xf32>
    tpu.vector_store %arg11[%c0_5, %c0_6], %10 {strides = array<i32>} : memref<4x1024xf32, #tpu.memory_space<vmem>>, vector<4x1024xf32>,
    %c7_i32 = arith.constant 7 : i32
    %12 = arith.cmpi eq, %arg1, %c7_i32 : i32
    %13 = arith.extui %12 : i1 to i32
    %c0_i32_7 = arith.constant 0 : i32
    %14 = arith.cmpi ne, %13, %c0_i32_7 : i32
    scf.if %14 {
      %c0_8 = arith.constant 0 : index
      %c0_9 = arith.constant 0 : index
      %15 = vector.load %arg11[%c0_8, %c0_9] : memref<4x1024xf32, #tpu.memory_space<vmem>>, vector<4x1024xf32>
      %16 = vector.extract_strided_slice %15 {offsets = [0, 0], sizes = [2, 512], strides = [1, 1]} : vector<4x1024xf32> to vector<2x512xf32>
      %17 = vector.extract_strided_slice %15 {offsets = [2, 512], sizes = [2, 512], strides = [1, 1]} : vector<4x1024xf32> to vector<2x512xf32>
      %18 = arith.subf %16, %17 : vector<2x512xf32>
      %c0_10 = arith.constant 0 : index
      %c0_11 = arith.constant 0 : index
      %19 = vector.load %arg7[%c0_10, %c0_11] : memref<2x512xf32, #tpu.memory_space<vmem>>, vector<1x512xf32>
      %20 = vector.broadcast %19 : vector<1x512xf32> to vector<2x512xf32>
      %21 = arith.addf %18, %20 : vector<2x512xf32>
      %cst_12 = arith.constant 0.000000e+00 : f32
      %22 = vector.broadcast %cst_12 : f32 to vector<2x512xf32>
      %23 = arith.maximumf %21, %22 : vector<2x512xf32>
      %24 = vector.extract_strided_slice %15 {offsets = [0, 512], sizes = [2, 512], strides = [1, 1]} : vector<4x1024xf32> to vector<2x512xf32>
      %25 = vector.extract_strided_slice %15 {offsets = [2, 0], sizes = [2, 512], strides = [1, 1]} : vector<4x1024xf32> to vector<2x512xf32>
      %26 = arith.addf %24, %25 : vector<2x512xf32>
      %c1 = arith.constant 1 : index
      %c0_13 = arith.constant 0 : index
      %27 = vector.load %arg7[%c1, %c0_13] : memref<2x512xf32, #tpu.memory_space<vmem>>, vector<1x512xf32>
      %28 = vector.broadcast %27 : vector<1x512xf32> to vector<2x512xf32>
      %29 = arith.addf %26, %28 : vector<2x512xf32>
      %cst_14 = arith.constant 0.000000e+00 : f32
      %30 = vector.broadcast %cst_14 : f32 to vector<2x512xf32>
      %31 = arith.maximumf %29, %30 : vector<2x512xf32>
      %32 = tpu.concatenate %23, %31 in 0 : vector<2x512xf32>, vector<2x512xf32> -> vector<4x512xf32>
      %c0_15 = arith.constant 0 : index
      %c0_16 = arith.constant 0 : index
      %33 = vector.load %arg8[%c0_15, %c0_16] : memref<512x256xf32, #tpu.memory_space<vmem>>, vector<512x256xf32>
      %cst_17 = arith.constant dense<0.000000e+00> : vector<4x256xf32>
      %34 = tpu.matmul %32, %33, %cst_17 {dimension_numbers = #tpu.dot_dimension_numbers<[1], [0], [0], [1], [0, 0, 1, 1], [], []>} : vector<4x512xf32>, vector<512x256xf32>, vector<4x256xf32> -> vector<4x256xf32>
      %c0_18 = arith.constant 0 : index
      %c0_19 = arith.constant 0 : index
      %c0_20 = arith.constant 0 : index
      %35 = vector.load %arg9[%c0_18, %c0_19, %c0_20] : memref<1x4x256xf32, #tpu.memory_space<vmem>>, vector<1x4x256xf32>
      %36 = vector.shape_cast %35 : vector<1x4x256xf32> to vector<4x256xf32>
      %37 = vector.shape_cast %34 : vector<4x256xf32> to vector<1x4x256xf32>
      tpu.vector_store %arg9[%c0_18, %c0_19, %c0_20], %37 {strides = array<i32>} : memref<1x4x256xf32, #tpu.memory_space<vmem>>, vector<1x4x256xf32>,
    } else {
    }
    return
  }
  func.func @transform_0(%arg0: i32, %arg1: i32) -> (i32, i32, i32) {
    %c0_i32 = arith.constant 0 : i32
    %c0_i32_0 = arith.constant 0 : i32
    %c0_i32_1 = arith.constant 0 : i32
    %c0_i32_2 = arith.constant 0 : i32
    return %c0_i32, %c0_i32_0, %c0_i32_1 : i32, i32, i32
  }
  func.func @transform_1(%arg0: i32, %arg1: i32) -> (i32, i32) {
    %c0_i32 = arith.constant 0 : i32
    %c0_i32_0 = arith.constant 0 : i32
    %c0_i32_1 = arith.constant 0 : i32
    return %c0_i32, %c0_i32_0 : i32, i32
  }
  func.func @transform_2(%arg0: i32, %arg1: i32) -> (i32, i32) {
    %c0_i32 = arith.constant 0 : i32
    %c0_i32_0 = arith.constant 0 : i32
    %c0_i32_1 = arith.constant 0 : i32
    return %c0_i32, %c0_i32_0 : i32, i32
  }
  func.func @transform_3(%arg0: i32, %arg1: i32) -> (i32, i32) {
    %c0_i32 = arith.constant 0 : i32
    %c0_i32_0 = arith.constant 0 : i32
    %c0_i32_1 = arith.constant 0 : i32
    return %c0_i32, %c0_i32_0 : i32, i32
  }
  func.func @transform_4(%arg0: i32, %arg1: i32) -> (i32, i32) {
    %c0_i32 = arith.constant 0 : i32
    return %arg1, %arg0 : i32, i32
  }
  func.func @transform_5(%arg0: i32, %arg1: i32) -> (i32, i32) {
    %c0_i32 = arith.constant 0 : i32
    %c0_i32_0 = arith.constant 0 : i32
    return %c0_i32, %arg0 : i32, i32
  }
  func.func @transform_6(%arg0: i32, %arg1: i32) -> (i32, i32) {
    %c0_i32 = arith.constant 0 : i32
    %c0_i32_0 = arith.constant 0 : i32
    return %arg0, %c0_i32 : i32, i32
  }
  func.func @transform_7(%arg0: i32, %arg1: i32) -> (i32, i32, i32) {
    %c0_i32 = arith.constant 0 : i32
    %c0_i32_0 = arith.constant 0 : i32
    %c0_i32_1 = arith.constant 0 : i32
    return %arg0, %c0_i32, %c0_i32_0 : i32, i32, i32
  }
}

</mosaic_0001>

<bundles_post_ra>
// kernel: complex_inception_aux_forward.1
= control target key start
LH: loop header
LB: loop body
LE: loop exit
PB: predicated region body
PF: predicated region fallthrough
CT: control target
= control target key end

     0   :  { %s5051_s0 = inlined_call_operand.vmem [shape: f32[2,392,4], index: 0, kind: input, shape index: {}]   ;;  %s5052_s1 = inlined_call_operand.hbm [shape: f32[32,392], index: 1, kind: input, shape index: {}]   ;;  %s5053_s2 = inlined_call_operand.hbm [shape: f32[4,256], index: 2, kind: input, shape index: {}]   ;;  %s5054_s3 = inlined_call_operand.hbm [shape: f32[4,128], index: 3, kind: input, shape index: {}]   ;;  %s5055_s4 = inlined_call_operand.hbm [shape: bf16[2048,2048], index: 4, kind: input, shape index: {}]   ;;  %s5056_s5 = inlined_call_operand.hbm [shape: f32[2,1024], index: 5, kind: input, shape index: {}]   ;;  %s5057_s6 = inlined_call_operand.hbm [shape: f32[1024,256], index: 6, kind: input, shape index: {}]   ;;  %s5058_s7 = inlined_call_operand.vmem [shape: f32[2,4,256], index: 7, kind: output, shape index: {}]  }
   0x1   :  { %5070 = sst [smem:[#allocation26_spill]] %s5051_s0 }
   0x2   :  { %5071 = sst [smem:[#allocation27_spill]] %s5052_s1 }
   0x3   :  { %5072 = sst [smem:[#allocation28_spill]] %s5053_s2 }
   0x4   :  { %5073 = sst [smem:[#allocation29_spill]] %s5054_s3 }
   0x5   :  { %5074 = sst [smem:[#allocation30_spill]] %s5058_s7 }
   0x6   :  { %12 = vsyncpa [#allocation5], 0 }
   0x7   :  { %13 = vsyncpa [#allocation7], 0 }
   0x8   :  { %14 = vsyncpa [#allocation10], 0 }
   0x9   :  { %16 = vsyncpa [#allocation10 + $0x1], 0 }
   0xa   :  { %17 = vsyncpa [#allocation13], 0 }
   0xb   :  { %19 = vsyncpa [#allocation13 + $0x1], 0  ;;  %s3962_s24 = smov 0   ;;  %s3964_s25 = smov 0  }
   0xc   :  { %s3966_s26 = smov 0   ;;  %s3968_s27 = smov 0  }
   0xd   :  { %s3970_s28 = smov 0   ;;  %s3972_s29 = smov 0  }
   0xe   :  { %s3974_s30 = smov 0   ;;  %s3976_s8 = smov 0  }
   0xf   :  { %s3978_s9 = smov 0   ;;  %s3980_s10 = smov 0  }
  0x10   :  { %s3982_s11 = smov 0  }
  0x11 LB: > { %5075 = sst [smem:[#allocation19_spill]] %s3887_s28  ;;  %s5059_s12 = sadd.s32 4294967295, %s3911_s11   ;;  %s3911_s11 = sphi %s3982_s11, %s25_s11   ;;  %s3907_s10 = sphi %s3980_s10, %s5111_s10   ;;  %s3903_s9 = sphi %s3978_s9, %s5110_s9   ;;  %s3899_s8 = sphi %s3976_s8, %s5109_s8   ;;  %s3895_s30 = sphi %s3974_s30, %s5108_s30   ;;  %s3891_s29 = sphi %s3972_s29, %s5107_s29   ;;  %s3887_s28 = sphi %s3970_s28, %s5106_s28   ;;  %s3883_s27 = sphi %s3968_s27, %s5100_s27   ;;  %s3879_s26 = sphi %s3966_s26, %s5105_s26   ;;  %s3875_s25 = sphi %s3964_s25, %s5104_s25   ;;  %s3871_s24 = sphi %s3962_s24, %s5103_s24  }
  0x12   : > { %5076 = sst [smem:[#allocation20_spill]] %s3895_s30  ;;  %p143_p0 = scmp.ne.s32.totalorder %s3887_s28, %s3883_s27 }
  0x13   : > { %5077 = sst [smem:[#allocation21_spill]] %s3899_s8  ;;  %p4017_p1 = scmp.eq.s32.totalorder %s5059_s12, 0 }
  0x14   : > { %p169_p2 = scmp.ne.s32.totalorder %s3875_s25, %s3871_s24  ;;  %p2697_p3 = scmp.ge.s32.totalorder %s3911_s11, 1 }
  0x15   : > { %p232_p4 = scmp.lt.s32.totalorder %s3911_s11, 17  ;;  %p4026_p5 = por %p4017_p1, %p143_p0 }
  0x16   : > { %p4032_p6 = por %p169_p2, %p4017_p1  ;;  %s5084_s2 = sld [smem:[#allocation28_spill]] }
  0x17   : > { %s5079_s14 = scalar_select %p4026_p5, 1, 0 }
  0x18   : > { %s5081_s15 = scalar_select %p4032_p6, 1, 0 }
  0x19   : > { %5080 = sst [smem:[#allocation22_spill]] %s5079_s14  ;;  %p4036_p7 = pnand %p2697_p3, %p232_p4 }
  0x1a   : > { %5082 = sst [smem:[#allocation23_spill]] %s5081_s15  ;;  %s3913_s20 = smov [#allocation6]  }
  0x1b   : > { %p3497_p8 = pneg %p4036_p7  ;;  %s263_s21 = sshll.u32 %s3913_s20, 4  ;;  %s264_s21 = int_to_ptr.vmem [resolvable:$true] %s263_s21 }
  0x1c   : > { %s261_s19 = sshll.u32 %s5084_s2, 4  ;;  %s34_s23 = sadd.s32 1, %s3903_s9  ;;  %s262_s19 = int_to_ptr.hbm [resolvable:$true] %s261_s19 }
  0x1d   : > { %p4047_p9 = pnand %p3497_p8, %p4017_p1  ;;  %p35_p10 = scmp.ge.s32.totalorder %s34_s23, 8 }
  0x1e   : > { %s37_s24 = sadd.s32 1, %s3907_s10  ;;  %s130_s27 = sadd.s32 1, %s3891_s29 }
  0x1f   : > { %3503 = dma.hbm_to_vmem [thread:$0]  (!%p4047_p9), %s262_s19, 128, %s264_s21, [#allocation7]  }
  0x20   : > { %p137_p11 = scmp.ne.s32.totalorder %s3891_s29, %s3887_s28  ;;  %s5113_s23 = smov (%p35_p10, %s34_s23), 0 }
  0x21   : > { %5086 = sst [smem:[#allocation24_spill]] %s5113_s23  ;;  %s5115_s24 = smov (!%p35_p10, %s37_s24), %s3907_s10 }
  0x22   : > { %s125_s17 = ssub.s32 %s3903_s9, %s5113_s23  ;;  %p138_p12 = scmp.eq.s32.totalorder %s3911_s11, 0 }
  0x23   : > { %p39_p13 = scmp.ge.s32.totalorder %s5115_s24, 2  ;;  %p3520_p2 = scmp.lt.s32.totalorder %s3911_s11, 16 }
  0x24   : > { %p4066_p0 = por %p138_p12, %p137_p11  ;;  %s286_s19 = sand.u32 1, %s3911_s11  }
  0x25   : > { %s5117_s24 = smov (%p39_p13, %s5115_s24), 0  ;;  %s288_s12 = sand.u32 1, %s3891_s29  }
  0x26   : > { %5088 = sst [smem:[#allocation25_spill]] %s5117_s24  ;;  %s4076_s20 = ssub.s32 %s3907_s10, %s5117_s24 }
  0x27   : > { %s127_s21 = sor.u32 %s4076_s20, %s125_s17  ;;  %s2702_s2 = sshll.u32 %s288_s12, 10 }
  0x28   : > { %p128_p3 = scmp.eq.s32.totalorder %s127_s21, 0  ;;  %s2704_s23 = sshll.u32 %s3907_s10, 3 }
  0x29   : > { %s3329_s30 = sshll.u32 %s3903_s9, 9  ;;  %s290_s7 = scalar_lea.vmem [#allocation9], %s2702_s2 }
  0x2a   : > { %s4082_s0 = scalar_select %p128_p3, %s3891_s29, %s130_s27  }
  0x2b   : > { %s301_s8 = sshll.u32 %s290_s7, 4  ;;  %s296_s15 = sadd.s32 %s3329_s30, %s2704_s23  ;;  %s302_s8 = int_to_ptr.vmem [resolvable:$true] %s301_s8 }
  0x2c   : > { %s2706_s14 = sshll.u32 %s296_s15, 2  ;;  %p3508_p4 = pnand %p3520_p2, %p4066_p0 }
  0x2d   : > { %s298_s17 = scalar_lea.hbm %s5055_s4, %s2706_s14  ;;  %s4094_s12 = scalar_lea.sflag [#allocation10], %s286_s19 }
  0x2e   : > { %s299_s21 = sshll.u32 %s298_s17, 4  ;;  %s3914_s2 = smov 1024   ;;  %s300_s21 = int_to_ptr.hbm [resolvable:$true] %s299_s21 }
  0x2f   : > { %s3915_s7 = smov 512   ;;  %s3916_s30 = smov 32  }
  0x30   : > { %3510 = dma.hbm_to_vmem [thread:$0]  (!%p3508_p4), %s300_s21, 16384, %s302_s8, %s4094_s12, %s3914_s2, %s3915_s7, %s3916_s30  }
  0x31   : > { %s5089_s1 = sld [smem:[#allocation27_spill]]  ;;  %s3917_s14 = smov [#allocation4]  }
  0x32   : > { %s248_s24 = sshll.u32 %s3917_s14, 4  ;;  %s5090_s3 = sld [smem:[#allocation29_spill]]  ;;  %s249_s24 = int_to_ptr.vmem [resolvable:$true] %s248_s24 }
  0x33   : > { %s3918_s8 = smov [#allocation8]   ;;  %p154_p8 = scmp.eq.s32.totalorder %s4076_s20, 0 }
  0x34   : > { %s275_s21 = sshll.u32 %s3918_s8, 4  ;;  %s156_s2 = sadd.s32 1, %s3879_s26  ;;  %s276_s21 = int_to_ptr.vmem [resolvable:$true] %s275_s21 }
  0x35   : > { %p163_p10 = scmp.ne.s32.totalorder %s3879_s26, %s3875_s25  ;;  %s313_s27 = sand.u32 1, %s3879_s26  }
  0x36   : > { %s4112_s15 = scalar_select %p154_p8, %s3879_s26, %s156_s2  }
  0x37   : > { %s246_s28 = sshll.u32 %s5089_s1, 4  ;;  %p165_p11 = por %p163_p10, %p138_p12  ;;  %s247_s28 = int_to_ptr.hbm [resolvable:$true] %s246_s28 }
  0x38   : > { %s273_s17 = sshll.u32 %s5090_s3, 4  ;;  %s2707_s14 = sshll.u32 %s313_s27, 3  ;;  %s274_s17 = int_to_ptr.hbm [resolvable:$true] %s273_s17 }
  0x39   : > { %3500 = dma.hbm_to_vmem [thread:$0]  (!%p4047_p9), %s247_s28, 2048, %s249_s24, [#allocation5], %s3915_s7, %s3915_s7, %s3916_s30  }
  0x3a   : > { %3506 = dma.hbm_to_vmem [thread:$0]  (!%p4047_p9), %s274_s17, 64, %s276_s21, [#allocation7]  }
  0x3b   : > { %s320_s30 = scalar_lea.hbm %s5056_s5, %s2704_s23  ;;  %s315_s20 = scalar_lea.vmem [#allocation11], %s2707_s14 }
  0x3c   : > { %s322_s28 = sshll.u32 %s320_s30, 4  ;;  %s324_s22 = sshll.u32 %s315_s20, 4  ;;  %s323_s28 = int_to_ptr.hbm [resolvable:$true] %s322_s28  ;;  %s325_s22 = int_to_ptr.vmem [resolvable:$true] %s324_s22 }
  0x3d   : > { %p3511_p9 = pnand %p3520_p2, %p165_p11  ;;  %s2710_s24 = sshll.u32 %s313_s27, 10 }
  0x3e   : > { %s3332_s19 = sshll.u32 %s3907_s10, 10  ;;  %s335_s17 = scalar_lea.vmem [#allocation12], %s2710_s24 }
  0x3f   : > { %3513 = dma.hbm_to_vmem [thread:$0]  (!%p3511_p9), %s323_s28, 128, %s325_s22, %s4094_s12  }
  0x40   : > { %s344_s8 = sshll.u32 %s335_s17, 4  ;;  %s341_s1 = scalar_lea.hbm %s5057_s6, %s3332_s19  ;;  %s345_s8 = int_to_ptr.vmem [resolvable:$true] %s344_s8 }
  0x41   : > { %s342_s3 = sshll.u32 %s341_s1, 4  ;;  %s332_s23 = scalar_lea.sflag [#allocation13], %s313_s27  ;;  %s343_s3 = int_to_ptr.hbm [resolvable:$true] %s342_s3 }
  0x42   : > { %s3919_s18 = smov 256   ;;  %s3920_s7 = smov 16  }
  0x43   : > { %3516 = dma.hbm_to_vmem [thread:$0]  (!%p3511_p9), %s343_s3, 16384, %s345_s8, %s332_s23, %s3919_s18, %s3919_s18, %s3920_s7  }
  0x44   : > { %356 = sbr.rel (%p4036_p7) target bundleno = 1004 (0x3ec), region = 48 }
  0x49   : > { %3850 = dma.done.wait (%p4017_p1), [#allocation5], 2048  }
  0x4a   : > { %3852 = vsyncadd (%p4017_p1), [#allocation5], 4294965248 }
  0x4b   : > { %3854 = dma.done.wait (%p4017_p1), [#allocation7], 192  }
  0x4c   : > { %3856 = vsyncadd (%p4017_p1), [#allocation7], 4294967104  ;;  %s5091_s1 = sadd.s32 4294967295, %s3911_s11   ;;  %s5092_s12 = sld [smem:[#allocation19_spill]] }
  0x4d   : > { %s373_s3 = sand.u32 1, %s5091_s1  }
  0x4e   : > { %s374_s30 = scalar_lea.sflag [#allocation10], %s373_s3 }
  0x52   : > { %s375_s14 = sand.u32 1, %s5092_s12  }
  0x53   : > { %s2718_s16 = sshll.u32 %s375_s14, 10 }
  0x54   : > { %s4142_s28 = scalar_lea.vmem [#allocation9], %s2718_s16 }
  0x55   : > { %3858 = dma.done.wait (%p4026_p5), %s374_s30, 16384  }
  0x56   : > { %3860 = vsyncadd (%p4026_p5), %s374_s30, 4294950912  ;;  %s385_s22 = sand.u32 1, %s3875_s25  }
  0x57   : > { %s2719_s13 = sshll.u32 %s385_s22, 3 }
  0x58   : > { %s4149_s24 = scalar_lea.vmem [#allocation11], %s2719_s13 }
  0x59   : > { %3862 = dma.done.wait (%p4032_p6), %s374_s30, 128  }
  0x5a   : > { %3864 = vsyncadd (%p4032_p6), %s374_s30, 4294967168  ;;  %s2720_s19 = sshll.u32 %s385_s22, 10  ;;  %s394_s17 = scalar_lea.sflag [#allocation13], %s385_s22 }
  0x5b   : > { %s4155_s8 = scalar_lea.vmem [#allocation12], %s2720_s19 }
  0x5c   : > { %3866 = dma.done.wait (%p4032_p6), %s394_s17, 16384  }
  0x5d   : > { %3868 = vsyncadd (%p4032_p6), %s394_s17, 4294950912  ;;  %s5095_s21 = sld [smem:[#allocation21_spill]] }
  0x5e   : > { %s5096_s7 = sld [smem:[#allocation30_spill]] }
  0x5f   : > { %s5097_s12 = sld [smem:[#allocation20_spill]] }
  0x63   : > { %p443_p1 = scmp.lt.s32.totalorder %s5095_s21, 1 }
  0x65   : > { %s5119_s21 = smov (!%p443_p1, %s5095_s21), 1  ;;  %p2723_p5 = scmp.ne.s32.totalorder %s5097_s12, 0 }
  0x66   : > { %s3333_s2 = sshll.u32 %s5119_s21, 3  ;;  %s5098_s14 = sld [smem:[#allocation26_spill]] (!%p2723_p5) }
  0x67   : > { %s4166_s1 = scalar_lea.vmem %s5096_s7, %s3333_s2  ;;  %451 = sbr.rel (%p2723_p5) target bundleno = 518 (0x206), region = 76 }
  0x6c   : > { %v483_v0 = vld [vmem:[%s5098_s14 + $0x78] sm:$0xff]  ;;  %v482_v1 = vld [vmem:[%s5098_s14 + $0x70] sm:$0xff]  ;;  %v481_v4 = vld [vmem:[%s5098_s14 + $0x68] sm:$0xff]  ;;  %vm517_vm0 = vcmask 64512   ;;  %vm842_vm1 = vcmask 1043456   ;;  %vm817_vm2 = vcmask 31744  }
  0x6d   : > { %530 = vmatpush.msra.mxu1 %v483_v0  ;;  %v515_v2 = vld [vmem:[%s5098_s14 + $0x178] sm:$0xff]  ;;  %v514_v3 = vld [vmem:[%s5098_s14 + $0x170] sm:$0xff]  ;;  %v513_v5 = vld [vmem:[%s5098_s14 + $0x168] sm:$0xff]  ;;  %vm1041_vm3 = vcmask 1041408   ;;  %vm1089_vm4 = vcmask 1045508  }
  0x6e   : > { %588 = vmatpush.msra.mxu2 %v515_v2  ;;  %v480_v6 = vld [vmem:[%s5098_s14 + $0x60] sm:$0xff]  ;;  %v479_v8 = vld [vmem:[%s5098_s14 + $0x58] sm:$0xff]  ;;  %v478_v10 = vld [vmem:[%s5098_s14 + $0x50] sm:$0xff] }
  0x6f   : > { %531 = vmatpush.msra.mxu1 %v482_v1  ;;  %v512_v7 = vld [vmem:[%s5098_s14 + $0x160] sm:$0xff]  ;;  %v511_v9 = vld [vmem:[%s5098_s14 + $0x158] sm:$0xff]  ;;  %v510_v11 = vld [vmem:[%s5098_s14 + $0x150] sm:$0xff] }
  0x70   : > { %589 = vmatpush.msra.mxu2 %v514_v3  ;;  %v477_v12 = vld [vmem:[%s5098_s14 + $0x48] sm:$0xff]  ;;  %v476_v14 = vld [vmem:[%s5098_s14 + $0x40] sm:$0xff]  ;;  %v475_v16 = vld [vmem:[%s5098_s14 + $0x38] sm:$0xff] }
  0x71   : > { %532 = vmatpush.msra.mxu1 %v481_v4  ;;  %v509_v13 = vld [vmem:[%s5098_s14 + $0x148] sm:$0xff]  ;;  %v508_v15 = vld [vmem:[%s5098_s14 + $0x140] sm:$0xff]  ;;  %v507_v17 = vld [vmem:[%s5098_s14 + $0x138] sm:$0xff] }
  0x72   : > { %590 = vmatpush.msra.mxu2 %v513_v5  ;;  %v474_v18 = vld [vmem:[%s5098_s14 + $0x30] sm:$0xff]  ;;  %v2759_v19 = vld [vmem:[%s5098_s14 + $0x280] sm:$0xff]  ;;  %v2758_v21 = vld [vmem:[%s5098_s14 + $0x278] sm:$0xff] }
  0x73   : > { %533 = vmatpush.msra.mxu1 %v480_v6  ;;  %v506_v20 = vld [vmem:[%s5098_s14 + $0x130] sm:$0xff]  ;;  %725 = vmatpush.msra.mxu0 %v2759_v19  ;;  %v473_v22 = vld [vmem:[%s5098_s14 + $0x28] sm:$0xff]  ;;  %v472_v25 = vld [vmem:[%s5098_s14 + $0x20] sm:$0xff] }
  0x74   : > { %591 = vmatpush.msra.mxu2 %v512_v7  ;;  %v2757_v23 = vld [vmem:[%s5098_s14 + $0x270] sm:$0xff]  ;;  %v505_v24 = vld [vmem:[%s5098_s14 + $0x128] sm:$0xff]  ;;  %v504_v27 = vld [vmem:[%s5098_s14 + $0x120] sm:$0xff] }
  0x75   : > { %534 = vmatpush.msra.mxu1 %v479_v8  ;;  %726 = vmatpush.msra.mxu0 %v2758_v21  ;;  %v2756_v26 = vld [vmem:[%s5098_s14 + $0x268] sm:$0xff]  ;;  %v471_v28 = vld [vmem:[%s5098_s14 + $0x18] sm:$0xff]  ;;  %v2755_v29 = vld [vmem:[%s5098_s14 + $0x260] sm:$0xff] }
  0x76   : > { %592 = vmatpush.msra.mxu2 %v511_v9  ;;  %v503_v30 = vld [vmem:[%s5098_s14 + $0x118] sm:$0xff]  ;;  %v470_v31 = vld [vmem:[%s5098_s14 + $0x10] sm:$0xff]  ;;  %v469_v34 = vld [vmem:[%s5098_s14 + $0x8] sm:$0xff] }
  0x77   : > { %535 = vmatpush.msra.mxu1 %v478_v10  ;;  %727 = vmatpush.msra.mxu0 %v2757_v23  ;;  %v2754_v32 = vld [vmem:[%s5098_s14 + $0x258] sm:$0xff]  ;;  %v502_v33 = vld [vmem:[%s5098_s14 + $0x110] sm:$0xff]  ;;  %v501_v36 = vld [vmem:[%s5098_s14 + $0x108] sm:$0xff] }
  0x78   : > { %593 = vmatpush.msra.mxu2 %v510_v11  ;;  %v2753_v35 = vld [vmem:[%s5098_s14 + $0x250] sm:$0xff]  ;;  %v468_v37 = vld [vmem:[%s5098_s14] sm:$0xff]  ;;  %v2752_v38 = vld [vmem:[%s5098_s14 + $0x248] sm:$0xff] }
  0x79   : > { %536 = vmatpush.msra.mxu1 %v477_v12  ;;  %728 = vmatpush.msra.mxu0 %v2756_v26  ;;  %v516_v39 = vld [vmem:[%s5098_s14 + $0x180] sm:$0xff]  ;;  %v4289_v40 = vld [vmem:[#allocation4] sm:$0xff]  ;;  %v499_v42 = vld [vmem:[%s5098_s14 + $0xf8] sm:$0xff] }
  0x7a   : > { %594 = vmatpush.msra.mxu2 %v509_v13  ;;  %v500_v41 = vld [vmem:[%s5098_s14 + $0x100] sm:$0xff]  ;;  %v4297_v43 = vld [vmem:[#allocation4 + $0x10] sm:$0xff]  ;;  %632 = vmatpush.msra.mxu3 %v516_v39  ;;  %v498_v46 = vld [vmem:[%s5098_s14 + $0xf0] sm:$0xff] }
  0x7b   : > { %537 = vmatpush.msra.mxu1 %v476_v14  ;;  %729 = vmatpush.msra.mxu0 %v2755_v29  ;;  %v2743_v44 = vld [vmem:[%s5098_s14 + $0x200] sm:$0xff]  ;;  %v2742_v48 = vld [vmem:[%s5098_s14 + $0x1f8] sm:$0xff]  ;;  %v497_v50 = vld [vmem:[%s5098_s14 + $0xe8] sm:$0xff] }
  0x7c   : > { %595 = vmatpush.msra.mxu2 %v508_v15  ;;  %v2751_v45 = vld [vmem:[%s5098_s14 + $0x240] sm:$0xff]  ;;  %v2750_v49 = vld [vmem:[%s5098_s14 + $0x238] sm:$0xff]  ;;  %v2741_v51 = vld [vmem:[%s5098_s14 + $0x1f0] sm:$0xff]  ;;  %3462 = vmatpush.msrb.mxu3 %v2743_v44 }
  0x7d   : > { %538 = vmatpush.msra.mxu1 %v475_v16  ;;  %730 = vmatpush.msra.mxu0 %v2754_v32  ;;  %v4309_v47 = vld [vmem:[#allocation4 + $0x18] sm:$0xff]  ;;  %v2749_v52 = vld [vmem:[%s5098_s14 + $0x230] sm:$0xff]  ;;  %v4332_v54 = vld [vmem:[#allocation4 + $0x20] sm:$0xff] }
  0x7e   : > { %596 = vmatpush.msra.mxu2 %v507_v17  ;;  %2724 = vmatmul.msk.f32.vlgmr.msra.gmra.mxu3 %vm517_vm0, %v4309_v47  ;;  %v496_v53 = vld [vmem:[%s5098_s14 + $0xe0] sm:$0xff]  ;;  %v2740_v55 = vld [vmem:[%s5098_s14 + $0x1e8] sm:$0xff]  ;;  %v495_v56 = vld [vmem:[%s5098_s14 + $0xd8] sm:$0xff] }
  0x7f   : > { %539 = vmatpush.msra.mxu1 %v474_v18  ;;  %731 = vmatpush.msra.mxu0 %v2753_v35  ;;  %v4340_v57 = vld [vmem:[#allocation4 + $0x30] sm:$0xff]  ;;  %v2739_v58 = vld [vmem:[%s5098_s14 + $0x1e0] sm:$0xff]  ;;  %v2748_v59 = vld [vmem:[%s5098_s14 + $0x228] sm:$0xff] }
  0x80   : > { %597 = vmatpush.msra.mxu2 %v506_v20  ;;  %3463 = vmatpush.msrb.mxu3 %v2742_v48  ;;  %v494_v60 = vld [vmem:[%s5098_s14 + $0xd0] sm:$0xff]  ;;  %v4352_v61 = vld [vmem:[#allocation4 + $0x38] sm:$0xff]  ;;  %v2738_v62 = vld [vmem:[%s5098_s14 + $0x1d8] sm:$0xff] }
  0x81   : > { %540 = vmatpush.msra.mxu1 %v473_v22  ;;  %732 = vmatpush.msra.mxu0 %v2752_v38  ;;  %v2747_v63 = vld [vmem:[%s5098_s14 + $0x220] sm:$0xff]  ;;  %v493_v0 = vld [vmem:[%s5098_s14 + $0xc8] sm:$0xff]  ;;  %v2737_v1 = vld [vmem:[%s5098_s14 + $0x1d0] sm:$0xff] }
  0x82   : > { %598 = vmatpush.msra.mxu2 %v505_v24  ;;  %v2746_v2 = vld [vmem:[%s5098_s14 + $0x218] sm:$0xff]  ;;  %v492_v3 = vld [vmem:[%s5098_s14 + $0xc0] sm:$0xff]  ;;  %v4375_v4 = vld [vmem:[#allocation4 + $0x40] sm:$0xff]  ;;  %3464 = vmatpush.msrb.mxu3 %v2741_v51 }
  0x83   : > { %541 = vmatpush.msra.mxu1 %v472_v25  ;;  %733 = vmatpush.msra.mxu0 %v2751_v45  ;;  %v2736_v5 = vld [vmem:[%s5098_s14 + $0x1c8] sm:$0xff]  ;;  %v491_v6 = vld [vmem:[%s5098_s14 + $0xb8] sm:$0xff]  ;;  %v2735_v8 = vld [vmem:[%s5098_s14 + $0x1c0] sm:$0xff] }
  0x84   : > { %599 = vmatpush.msra.mxu2 %v504_v27  ;;  %v4383_v7 = vld [vmem:[#allocation4 + $0x50] sm:$0xff]  ;;  %v2745_v9 = vld [vmem:[%s5098_s14 + $0x210] sm:$0xff]  ;;  %3465 = vmatpush.msrb.mxu3 %v2740_v55  ;;  %v4395_v11 = vld [vmem:[#allocation4 + $0x58] sm:$0xff] }
  0x85   : > { %542 = vmatpush.msra.mxu1 %v471_v28  ;;  %734 = vmatpush.msra.mxu0 %v2750_v49  ;;  %v490_v10 = vld [vmem:[%s5098_s14 + $0xb0] sm:$0xff]  ;;  %v2734_v12 = vld [vmem:[%s5098_s14 + $0x1b8] sm:$0xff]  ;;  %v2744_v13 = vld [vmem:[%s5098_s14 + $0x208] sm:$0xff] }
  0x86   : > { %600 = vmatpush.msra.mxu2 %v503_v30  ;;  %2725 = vmatmul.msk.f32.gmra.mxu3 %vm517_vm0, %v4352_v61  ;;  %v489_v14 = vld [vmem:[%s5098_s14 + $0xa8] sm:$0xff]  ;;  %v2733_v15 = vld [vmem:[%s5098_s14 + $0x1b0] sm:$0xff]  ;;  %v488_v16 = vld [vmem:[%s5098_s14 + $0xa0] sm:$0xff] }
  0x87   : > { %543 = vmatpush.msra.mxu1 %v470_v31  ;;  %735 = vmatpush.msra.mxu0 %v2749_v52  ;;  %v453_v17 = vld [vmem:[#allocation4 + $0x8] sm:$0xff]  ;;  %v4415_v18 = vld [vmem:[#allocation4 + $0x60] sm:$0xff]  ;;  %v487_v20 = vld [vmem:[%s5098_s14 + $0x98] sm:$0xff] }
  0x88   : > { %601 = vmatpush.msra.mxu2 %v502_v33  ;;  %v2732_v19 = vld [vmem:[%s5098_s14 + $0x1a8] sm:$0xff]  ;;  %v4423_v21 = vld [vmem:[#allocation4 + $0x70] sm:$0xff]  ;;  %3466 = vmatpush.msrb.mxu3 %v2739_v58  ;;  %v2731_v22 = vld [vmem:[%s5098_s14 + $0x1a0] sm:$0xff] }
  0x89   : > { %544 = vmatpush.msra.mxu1 %v469_v34  ;;  %736 = vmatpush.msra.mxu0 %v2748_v59  ;;  %v486_v23 = vld [vmem:[%s5098_s14 + $0x90] sm:$0xff]  ;;  %v4432_v24 = vld [vmem:[#allocation4 + $0x78] sm:$0xff]  ;;  %v2730_v25 = vld [vmem:[%s5098_s14 + $0x198] sm:$0xff] }
  0x8a   : > { %602 = vmatpush.msra.mxu2 %v501_v36  ;;  %v485_v26 = vld [vmem:[%s5098_s14 + $0x88] sm:$0xff]  ;;  %3467 = vmatpush.msrb.mxu3 %v2738_v62  ;;  %v2729_v27 = vld [vmem:[%s5098_s14 + $0x190] sm:$0xff]  ;;  %v484_v28 = vld [vmem:[%s5098_s14 + $0x80] sm:$0xff] }
  0x8b   : > { %545 = vmatpush.msra.mxu1 %v468_v37  ;;  %737 = vmatpush.msra.mxu0 %v2747_v63  ;;  %v457_v29 = vld [vmem:[#allocation4 + $0x28] sm:$0xff]  ;;  %v2728_v30 = vld [vmem:[%s5098_s14 + $0x188] sm:$0xff]  ;;  %v2775_v31 = vld [vmem:[%s5098_s14 + $0x300] sm:$0xff] }
  0x8c   : > { %546 = vmatmul.f32.vlgmr.msra.gmra.mxu1 %v4289_v40  ;;  %603 = vmatpush.msra.mxu2 %v500_v41  ;;  %v2776_v32 = vld [vmem:[%s5098_s14 + $0x308] sm:$0xff]  ;;  %v2774_v33 = vld [vmem:[%s5098_s14 + $0x2f8] sm:$0xff]  ;;  %v2773_v34 = vld [vmem:[%s5098_s14 + $0x2f0] sm:$0xff] }
  0x8d   : > { %559 = vmatpush.msrb.mxu1 %v499_v42  ;;  %604 = vmatmul.f32.vlgmr.msra.gmra.mxu2 %v4297_v43  ;;  %v2772_v35 = vld [vmem:[%s5098_s14 + $0x2e8] sm:$0xff]  ;;  %v461_v36 = vld [vmem:[#allocation4 + $0x48] sm:$0xff]  ;;  %v2771_v37 = vld [vmem:[%s5098_s14 + $0x2e0] sm:$0xff] }
  0x8e   : > { %696 = vmatpush.msrb.mxu2 %v2743_v44  ;;  %738 = vmatpush.msra.mxu0 %v2746_v2  ;;  %v2770_v38 = vld [vmem:[%s5098_s14 + $0x2d8] sm:$0xff]  ;;  %v2769_v39 = vld [vmem:[%s5098_s14 + $0x2d0] sm:$0xff]  ;;  %v2767_v42 = vld [vmem:[%s5098_s14 + $0x2c0] sm:$0xff] }
  0x8f   : > { %560 = vmatpush.msrb.mxu1 %v498_v46  ;;  %2726 = vmatmul.msk.f32.gmra.mxu3 %vm517_vm0, %v4395_v11  ;;  %v465_v41 = vld [vmem:[#allocation4 + $0x68] sm:$0xff]  ;;  %v2766_v44 = vld [vmem:[%s5098_s14 + $0x2b8] sm:$0xff]  ;;  %v2764_v46 = vld [vmem:[%s5098_s14 + $0x2a8] sm:$0xff] }
  0x90   : > { %697 = vmatpush.msrb.mxu2 %v2742_v48  ;;  %739 = vmatpush.msra.mxu0 %v2745_v9  ;;  %v2765_v45 = vld [vmem:[%s5098_s14 + $0x2b0] sm:$0xff]  ;;  %v2763_v48 = vld [vmem:[%s5098_s14 + $0x2a0] sm:$0xff]  ;;  %v2762_v49 = vld [vmem:[%s5098_s14 + $0x298] sm:$0xff] }
  0x91   : > { %561 = vmatpush.msrb.mxu1 %v497_v50  ;;  %3468 = vmatpush.msrb.mxu3 %v2737_v1  ;;  %v2761_v50 = vld [vmem:[%s5098_s14 + $0x290] sm:$0xff] }
  0x92   : > { %698 = vmatpush.msrb.mxu2 %v2741_v51  ;;  %740 = vmatpush.msra.mxu0 %v2744_v13  ;;  %v2760_v51 = vld [vmem:[%s5098_s14 + $0x288] sm:$0xff] }
  0x93   : > { %562 = vmatpush.msrb.mxu1 %v496_v53  ;;  %741 = vmatmul.f32.vlgmr.msra.gmra.mxu0 %v453_v17 }
  0x94   : > { %549 = vmatmul.f32.gmra.mxu1 %v4332_v54  ;;  %699 = vmatpush.msrb.mxu2 %v2740_v55 }
  0x95   : > { %563 = vmatpush.msrb.mxu1 %v495_v56  ;;  %607 = vmatmul.f32.gmra.mxu2 %v4340_v57 }
  0x96   : > { %700 = vmatpush.msrb.mxu2 %v2739_v58  ;;  %3469 = vmatpush.msrb.mxu3 %v2736_v5 }
  0x97   : > { %564 = vmatpush.msrb.mxu1 %v494_v60  ;;  %2727 = vmatmul.msk.f32.gmra.mxu3 %vm517_vm0, %v4432_v24 }
  0x98   : > { %701 = vmatpush.msrb.mxu2 %v2738_v62  ;;  %3470 = vmatpush.msrb.mxu3 %v2735_v8 }
  0x99   : > { %565 = vmatpush.msrb.mxu1 %v493_v0 }
  0x9a   : > { %702 = vmatpush.msrb.mxu2 %v2737_v1  ;;  %3471 = vmatpush.msrb.mxu3 %v2734_v12 }
  0x9b   : > { %566 = vmatpush.msrb.mxu1 %v492_v3  ;;  %744 = vmatmul.f32.gmra.mxu0 %v457_v29 }
  0x9c   : > { %552 = vmatmul.f32.gmra.mxu1 %v4375_v4  ;;  %703 = vmatpush.msrb.mxu2 %v2736_v5 }
  0x9d   : > { %567 = vmatpush.msrb.mxu1 %v491_v6  ;;  %610 = vmatmul.f32.gmra.mxu2 %v4383_v7 }
  0x9e   : > { %704 = vmatpush.msrb.mxu2 %v2735_v8  ;;  %3472 = vmatpush.msrb.mxu3 %v2733_v15 }
  0x9f   : > { %568 = vmatpush.msrb.mxu1 %v490_v10 }
  0xa0   : > { %705 = vmatpush.msrb.mxu2 %v2734_v12  ;;  %3473 = vmatpush.msrb.mxu3 %v2732_v19 }
  0xa1   : > { %569 = vmatpush.msrb.mxu1 %v489_v14 }
  0xa2   : > { %706 = vmatpush.msrb.mxu2 %v2733_v15  ;;  %3474 = vmatpush.msrb.mxu3 %v2731_v22 }
  0xa3   : > { %570 = vmatpush.msrb.mxu1 %v488_v16  ;;  %747 = vmatmul.f32.gmra.mxu0 %v461_v36 }
  0xa4   : > { %555 = vmatmul.f32.gmra.mxu1 %v4415_v18  ;;  %707 = vmatpush.msrb.mxu2 %v2732_v19 }
  0xa5   : > { %571 = vmatpush.msrb.mxu1 %v487_v20  ;;  %613 = vmatmul.f32.gmra.mxu2 %v4423_v21 }
  0xa6   : > { %708 = vmatpush.msrb.mxu2 %v2731_v22  ;;  %3475 = vmatpush.msrb.mxu3 %v2730_v25 }
  0xa7   : > { %572 = vmatpush.msrb.mxu1 %v486_v23 }
  0xa8   : > { %709 = vmatpush.msrb.mxu2 %v2730_v25  ;;  %3476 = vmatpush.msrb.mxu3 %v2729_v27 }
  0xa9   : > { %573 = vmatpush.msrb.mxu1 %v485_v26 }
  0xaa   : > { %710 = vmatpush.msrb.mxu2 %v2729_v27  ;;  %3477 = vmatpush.msrb.mxu3 %v2728_v30 }
  0xab   : > { %574 = vmatpush.msrb.mxu1 %v484_v28  ;;  %750 = vmatmul.f32.gmra.mxu0 %v465_v41 }
  0xac   : > { %575 = vmatmul.f32.vlgmr.msrb.gmra.mxu1 %v453_v17  ;;  %711 = vmatpush.msrb.mxu2 %v2728_v30 }
  0xad   : > { %754 = vmatpush.msra.mxu1 %v2775_v31  ;;  %712 = vmatmul.f32.vlgmr.msrb.gmra.mxu2 %v4289_v40  ;;  %v2768_v40 = vld [vmem:[%s5098_s14 + $0x2c8] sm:$0xff] }
  0xae   : > { %798 = vmatpush.msra.mxu2 %v2776_v32  ;;  %721 = vmatmul.f32.vlgmr.msrb.gmra.mxu3 %v4415_v18 }
  0xaf   : > { %755 = vmatpush.msra.mxu1 %v2774_v33 }
  0xb1   : > { %756 = vmatpush.msra.mxu1 %v2773_v34 }
  0xb3   : > { %757 = vmatpush.msra.mxu1 %v2772_v35 }
  0xb4   : > { %578 = vmatmul.f32.gmra.mxu1 %v457_v29 }
  0xb5   : > { %758 = vmatpush.msra.mxu1 %v2771_v37  ;;  %715 = vmatmul.f32.gmra.mxu2 %v4332_v54 }
  0xb7   : > { %759 = vmatpush.msra.mxu1 %v2770_v38 }
  0xb9   : > { %760 = vmatpush.msra.mxu1 %v2769_v39 }
  0xbb   : > { %761 = vmatpush.msra.mxu1 %v2768_v40 }
  0xbc   : > { %581 = vmatmul.f32.gmra.mxu1 %v461_v36 }
  0xbd   : > { %762 = vmatpush.msra.mxu1 %v2767_v42  ;;  %718 = vmatmul.f32.gmra.mxu2 %v4375_v4 }
  0xbf   : > { %763 = vmatpush.msra.mxu1 %v2766_v44 }
  0xc1   : > { %764 = vmatpush.msra.mxu1 %v2765_v45 }
  0xc3   : > { %765 = vmatpush.msra.mxu1 %v2764_v46 }
  0xc4   : > { %584 = vmatmul.f32.gmra.mxu1 %v465_v41 }
  0xc5   : > { %766 = vmatpush.msra.mxu1 %v2763_v48  ;;  %2777 = vmatmul.msk.f32.vlgmr.msra.gmra.mxu2 %vm517_vm0, %v4309_v47  ;;  %v812_v47 = vld [vmem:[#allocation6] sm:$0xff] }
  0xc6   : > { %814 = vst [vmem:[#allocation1] ss:$2 sm:$0xff] %v812_v47 }
  0xc7   : > { %767 = vmatpush.msra.mxu1 %v2762_v49 }
  0xc9   : > { %768 = vmatpush.msra.mxu1 %v2761_v50 }
  0xcb   : > { %769 = vmatpush.msra.mxu1 %v2760_v51 }
  0xcc   : > { %770 = vmatmul.f32.vlgmr.msra.gmra.mxu1 %v4297_v43 }
  0xcd   : > { %2778 = vmatmul.msk.f32.gmra.mxu2 %vm517_vm0, %v4352_v61  ;;  %v816_v43 = vld.sshfl [vmem:[#allocation1 + $0x8] sm:$0xff pattern:$0x75316420]  ;;  %v815_v53 = vld.sshfl [vmem:[#allocation1] sm:$0xff pattern:$0x75316420] }
  0xce   : > { %2790 = vmatpush.msk.msrb.mxu0 %vm842_vm1, %v816_v43  ;;  %2781 = vmatpush.msk.msra.mxu3 %vm842_vm1, %v815_v53  ;;  %v4542_v53 = vld [vmem:[#allocation8] ss:$0 sm:$0xff] }
  0xd0   : > { %3478 = vmatpush.msk.msrb.mxu3 %vm842_vm1, %v816_v43 }
  0xd4   : > { %773 = vmatmul.f32.gmra.mxu1 %v4340_v57 }
  0xd5   : > { %2779 = vmatmul.msk.f32.gmra.mxu2 %vm517_vm0, %v4395_v11 }
  0xdc   : > { %776 = vmatmul.f32.gmra.mxu1 %v4383_v7 }
  0xdd   : > { %2780 = vmatmul.msk.f32.gmra.mxu2 %vm517_vm0, %v4432_v24 }
  0xe4   : > { %779 = vmatmul.f32.gmra.mxu1 %v4423_v21 }
 0x101   : > { %v634_v60 = vpop.f32.mrf.mxu3 }
 0x109   : > { %v547_v52 = vpop.f32.mrf.mxu1  ;;  %v637_v2 = vpop.f32.mrf.mxu3 }
 0x110   : > { %v605_v54 = vpop.f32.mrf.mxu2  ;;  %v742_v14 = vpop.f32.mrf.mxu0 }
 0x111   : > { %v550_v55 = vpop.f32.mrf.mxu1 }
 0x112   : > { %v640_v10 = vpop.f32.mrf.mxu3 }
 0x118   : > { %v608_v56 = vpop.f32.mrf.mxu2  ;;  %v745_v23 = vpop.f32.mrf.mxu0 }
 0x119   : > { %v553_v57 = vpop.f32.mrf.mxu1 }
 0x11a   : > { %v643_v18 = vpop.f32.mrf.mxu3 }
 0x120   : > { %v611_v58 = vpop.f32.mrf.mxu2  ;;  %v748_v31 = vpop.f32.mrf.mxu0 }
 0x121   : > { %v556_v59 = vpop.f32.mrf.mxu1 }
 0x128   : > { %v614_v61 = vpop.f32.mrf.mxu2  ;;  %v751_v38 = vpop.f32.mrf.mxu0 }
 0x129   : > { %v576_v62 = vpop.f32.mrf.mxu1 }
 0x12a   : > { %v577_v63 = vadd.f32 %v576_v62, %v547_v52  ;;  %v4550_v62 = vld [vmem:[#allocation8 + $0x3] ss:$0 sm:$0xff] }
 0x12c   : > { %v606_v0 = vadd.f32 %v605_v54, %v577_v63 }
 0x12e   : > { %v635_v1 = vadd.f32 %v634_v60, %v606_v0 }
 0x130   : > { %2782 = vmatmul.msk.f32.vlgmr.msra.gmra.mxu3 %vm817_vm2, %v635_v1  ;;  %2791 = vmatmul.msk.f32.vlgmr.msrb.gmra.mxu0 %vm817_vm2, %v635_v1  ;;  %v713_v3 = vpop.f32.mrf.mxu2 }
 0x131   : > { %v579_v4 = vpop.f32.mrf.mxu1  ;;  %v743_v21 = vadd.f32 %v742_v14, %v713_v3  ;;  %v722_v37 = vpop.f32.mrf.mxu3 }
 0x132   : > { %v580_v5 = vadd.f32 %v579_v4, %v550_v55  ;;  %v752_v40 = vadd.f32 %v751_v38, %v722_v37 }
 0x134   : > { %v609_v6 = vadd.f32 %v608_v56, %v580_v5 }
 0x136   : > { %v638_v7 = vadd.f32 %v637_v2, %v609_v6 }
 0x138   : > { %2783 = vmatmul.msk.f32.gmra.mxu3 %vm817_vm2, %v638_v7  ;;  %2792 = vmatmul.msk.f32.gmra.mxu0 %vm817_vm2, %v638_v7  ;;  %v716_v8 = vpop.f32.mrf.mxu2 }
 0x139   : > { %v582_v9 = vpop.f32.mrf.mxu1  ;;  %v746_v27 = vadd.f32 %v745_v23, %v716_v8 }
 0x13a   : > { %v583_v11 = vadd.f32 %v582_v9, %v553_v57  ;;  %v4545_v57 = vld [vmem:[#allocation8 + $0x1] ss:$0 sm:$0xff] }
 0x13c   : > { %v612_v12 = vadd.f32 %v611_v58, %v583_v11  ;;  %v4547_v58 = vld [vmem:[#allocation8 + $0x2] ss:$0 sm:$0xff] }
 0x13e   : > { %v641_v13 = vadd.f32 %v640_v10, %v612_v12 }
 0x140   : > { %2784 = vmatmul.msk.f32.gmra.mxu3 %vm817_vm2, %v641_v13  ;;  %2793 = vmatmul.msk.f32.gmra.mxu0 %vm817_vm2, %v641_v13  ;;  %v719_v15 = vpop.f32.mrf.mxu2 }
 0x141   : > { %v585_v16 = vpop.f32.mrf.mxu1  ;;  %v749_v33 = vadd.f32 %v748_v31, %v719_v15 }
 0x142   : > { %v586_v17 = vadd.f32 %v585_v16, %v556_v59 }
 0x144   : > { %v615_v19 = vadd.f32 %v614_v61, %v586_v17 }
 0x146   : > { %v644_v20 = vadd.f32 %v643_v18, %v615_v19 }
 0x148   : > { %2785 = vmatmul.msk.f32.gmra.mxu3 %vm817_vm2, %v644_v20  ;;  %2794 = vmatmul.msk.f32.gmra.mxu0 %vm817_vm2, %v644_v20  ;;  %v800_v22 = vpop.f32.mrf.mxu2 }
 0x149   : > { %v771_v24 = vpop.f32.mrf.mxu1 }
 0x14a   : > { %v772_v25 = vadd.f32 %v771_v24, %v743_v21 }
 0x14c   : > { %v801_v26 = vadd.f32 %v800_v22, %v772_v25 }
 0x150   : > { %2786 = vmatmul.msk.f32.gmra.mxu3 %vm817_vm2, %v801_v26  ;;  %2795 = vmatmul.msk.f32.gmra.mxu0 %vm817_vm2, %v801_v26  ;;  %v803_v28 = vpop.f32.mrf.mxu2 }
 0x151   : > { %v774_v29 = vpop.f32.mrf.mxu1 }
 0x152   : > { %v775_v30 = vadd.f32 %v774_v29, %v746_v27 }
 0x154   : > { %v804_v32 = vadd.f32 %v803_v28, %v775_v30 }
 0x158   : > { %2787 = vmatmul.msk.f32.gmra.mxu3 %vm817_vm2, %v804_v32  ;;  %2796 = vmatmul.msk.f32.gmra.mxu0 %vm817_vm2, %v804_v32  ;;  %v806_v35 = vpop.f32.mrf.mxu2 }
 0x159   : > { %v777_v34 = vpop.f32.mrf.mxu1 }
 0x15a   : > { %v778_v36 = vadd.f32 %v777_v34, %v749_v33 }
 0x15c   : > { %v807_v39 = vadd.f32 %v806_v35, %v778_v36 }
 0x160   : > { %2788 = vmatmul.msk.f32.gmra.mxu3 %vm817_vm2, %v807_v39  ;;  %2797 = vmatmul.msk.f32.gmra.mxu0 %vm817_vm2, %v807_v39  ;;  %v809_v42 = vpop.f32.mrf.mxu2 }
 0x161   : > { %v780_v41 = vpop.f32.mrf.mxu1 }
 0x162   : > { %v781_v44 = vadd.f32 %v780_v41, %v752_v40 }
 0x164   : > { %v810_v45 = vadd.f32 %v809_v42, %v781_v44 }
 0x168   : > { %2789 = vmatmul.msk.f32.gmra.mxu3 %vm817_vm2, %v810_v45 }
 0x170   : > { %2798 = vmatmul.msk.f32.vlgmr.msrb.gmra.mxu3 %vm817_vm2, %v810_v45 }
 0x1ad   : > { %v905_v46 = vpop.f32.mrf.mxu0 }
 0x1b3   : > { %v864_v48 = vpop.f32.mrf.mxu3 }
 0x1b5   : > { %v908_v49 = vpop.f32.mrf.mxu0 }
 0x1bb   : > { %v867_v50 = vpop.f32.mrf.mxu3 }
 0x1bd   : > { %v911_v51 = vpop.f32.mrf.mxu0 }
 0x1c3   : > { %v870_v47 = vpop.f32.mrf.mxu3 }
 0x1c5   : > { %v4538_v52 = vpop.f32.mrf.mxu0 }
 0x1cb   : > { %v4540_v43 = vpop.f32.mrf.mxu3 }
 0x1cd   : > { %v917_v54 = vpop.f32.mrf.mxu0 }
 0x1ce   : > { %v929_v55 = vsub.f32 %v864_v48, %v917_v54 }
 0x1d0   : > { %v939_v56 = vmul.f32 %v4542_v53, %v929_v55 }
 0x1d2   : > { %v945_v60 = vadd.f32 %v4545_v57, %v939_v56 }
 0x1d3   : > { %v876_v59 = vpop.f32.mrf.mxu3 }
 0x1d4   : > { %v933_v61 = vadd.f32 %v905_v46, %v876_v59  ;;  %v949_v2 = vmax.f32 %v945_v60, 0.0  ;;  %v3921_v46 = vmov 0.0  }
 0x1d5   : > { %v920_v63 = vpop.f32.mrf.mxu0  ;;  %1123 = vst [vmem:[#allocation3 + $0x10] sm:$0xff] %v3921_v46 }
 0x1d6   : > { %v955_v0 = vmul.f32 %v4547_v58, %v933_v61  ;;  %v930_v1 = vsub.f32 %v867_v50, %v920_v63  ;;  %v970_v8 = vrot.slane %v949_v2, 2  ;;  %v972_v12 = vrot.slane %v949_v2, 4  ;;  %1124 = vst [vmem:[#allocation3] sm:$0xff] %v3921_v46 }
 0x1d7   : > { %v974_v13 = vrot.slane %v949_v2, 6  ;;  %1125 = vst [vmem:[#allocation3 + $0x18] sm:$0xff] %v3921_v46 }
 0x1d8   : > { %v961_v3 = vadd.f32 %v4550_v62, %v955_v0  ;;  %v940_v4 = vmul.f32 %v4542_v53, %v930_v1  ;;  %1126 = vst [vmem:[#allocation3 + $0x8] sm:$0xff] %v3921_v46 }
 0x1da   : > { %v965_v5 = vmax.f32 %v961_v3, 0.0  ;;  %v946_v6 = vadd.f32 %v4545_v57, %v940_v4 }
 0x1db   : > { %v879_v7 = vpop.f32.mrf.mxu3 }
 0x1dc   : > { %v1000_v9 = vrot.slane %v965_v5, 6  ;;  %v2800_v10 = vrot.slane %v965_v5, 10  ;;  %v934_v11 = vadd.f32 %v908_v49, %v879_v7  ;;  %v1043_v17 = vsel %vm1041_vm3, %v970_v8, %v965_v5 }
 0x1dd   : > { %v923_v14 = vpop.f32.mrf.mxu0  ;;  %v950_v20 = vmax.f32 %v946_v6, 0.0 }
 0x1de   : > { %v1015_v15 = vrot.slane %v1000_v9, 6  ;;  %v1042_v16 = vsel %vm1041_vm3, %v949_v2, %v1000_v9  ;;  %v956_v18 = vmul.f32 %v4547_v58, %v934_v11  ;;  %v1044_v21 = vsel %vm1041_vm3, %v972_v12, %v2800_v10 }
 0x1df   : > { %v1058_v19 = vpack.c.bf16 %v1043_v17, %v1042_v16  ;;  %v931_v24 = vsub.f32 %v870_v47, %v923_v14  ;;  %v977_v31 = vrot.slane %v950_v20, 2  ;;  %v979_v32 = vrot.slane %v950_v20, 4 }
 0x1e0   : > { %v1045_v22 = vsel %vm1041_vm3, %v974_v13, %v1015_v15  ;;  %v962_v23 = vadd.f32 %v4550_v62, %v956_v18  ;;  %v981_v35 = vrot.slane %v950_v20, 6 }
 0x1e1   : > { %v1059_v25 = vpack.c.bf16 %v1045_v22, %v1044_v21  ;;  %v1074_v26 = vrot.slane %v1058_v19, 2  ;;  %v941_v28 = vmul.f32 %v4542_v53, %v931_v24 }
 0x1e2   : > { %v966_v27 = vmax.f32 %v962_v23, 0.0 }
 0x1e3   : > { %v1075_v29 = vrot.slane %v1059_v25, 4  ;;  %v1076_v30 = vrot.slane %v1059_v25, 6  ;;  %v882_v33 = vpop.f32.mrf.mxu3  ;;  %v1088_v34 = vsel %vm1041_vm3, %v1058_v19, %v1074_v26  ;;  %v947_v45 = vadd.f32 %v4545_v57, %v941_v28 }
 0x1e4   : > { %v1004_v36 = vrot.slane %v966_v27, 6  ;;  %v2802_v37 = vrot.slane %v966_v27, 10  ;;  %v1047_v39 = vsel %vm1041_vm3, %v977_v31, %v966_v27  ;;  %v935_v40 = vadd.f32 %v911_v51, %v882_v33 }
 0x1e5   : > { %v1092_v38 = vsel %vm1089_vm4, %v1075_v29, %v1076_v30  ;;  %v951_v55 = vmax.f32 %v947_v45, 0.0 }
 0x1e6   : > { %v1093_v41 = vsel %vm842_vm1, %v1088_v34, %v1092_v38  ;;  %v1018_v42 = vrot.slane %v1004_v36, 6  ;;  %v1046_v44 = vsel %vm1041_vm3, %v950_v20, %v1004_v36  ;;  %v957_v49 = vmul.f32 %v4547_v58, %v935_v40 }
 0x1e7   : > { %1119 = vst [vmem:[#allocation2] sm:$0xff] %v1093_v41  ;;  %v1060_v48 = vpack.c.bf16 %v1047_v39, %v1046_v44  ;;  %v1048_v50 = vsel %vm1041_vm3, %v979_v32, %v2802_v37  ;;  %v984_v4 = vrot.slane %v951_v55, 2  ;;  %v986_v7 = vrot.slane %v951_v55, 4 }
 0x1e8   : > { %v1049_v47 = vsel %vm1041_vm3, %v981_v35, %v1018_v42  ;;  %v963_v56 = vadd.f32 %v4550_v62, %v957_v49  ;;  %v988_v9 = vrot.slane %v951_v55, 6 }
 0x1e9   : > { %v1061_v54 = vpack.c.bf16 %v1049_v47, %v1048_v50  ;;  %v1077_v51 = vrot.slane %v1060_v48, 2 }
 0x1ea   : > { %v967_v63 = vmax.f32 %v963_v56, 0.0 }
 0x1eb   : > { %v1078_v59 = vrot.slane %v1061_v54, 4  ;;  %v1079_v60 = vrot.slane %v1061_v54, 6  ;;  %v885_v61 = vpop.f32.mrf.mxu3  ;;  %v1096_v1 = vsel %vm1041_vm3, %v1060_v48, %v1077_v51 }
 0x1ec   : > { %v936_v0 = vadd.f32 %v4538_v52, %v885_v61  ;;  %v1008_v5 = vrot.slane %v967_v63, 6  ;;  %v2804_v6 = vrot.slane %v967_v63, 10  ;;  %v1051_v12 = vsel %vm1041_vm3, %v984_v4, %v967_v63 }
 0x1ed   : > { %v1099_v2 = vsel %vm1089_vm4, %v1078_v59, %v1079_v60 }
 0x1ee   : > { %v1100_v3 = vsel %vm842_vm1, %v1096_v1, %v1099_v2  ;;  %v958_v8 = vmul.f32 %v4547_v58, %v936_v0  ;;  %v1021_v10 = vrot.slane %v1008_v5, 6  ;;  %v1050_v11 = vsel %vm1041_vm3, %v951_v55, %v1008_v5 }
 0x1ef   : > { %1120 = vst [vmem:[#allocation2 + $0x8] sm:$0xff] %v1100_v3  ;;  %v1062_v52 = vpack.c.bf16 %v1051_v12, %v1050_v11  ;;  %v1052_v14 = vsel %vm1041_vm3, %v986_v7, %v2804_v6 }
 0x1f0   : > { %v964_v13 = vadd.f32 %v4550_v62, %v958_v8  ;;  %v1053_v15 = vsel %vm1041_vm3, %v988_v9, %v1021_v10 }
 0x1f1   : > { %v1063_v16 = vpack.c.bf16 %v1053_v15, %v1052_v14  ;;  %v1080_v17 = vrot.slane %v1062_v52, 2 }
 0x1f2   : > { %v968_v19 = vmax.f32 %v964_v13, 0.0 }
 0x1f3   : > { %v926_v18 = vpop.f32.mrf.mxu3  ;;  %v1081_v58 = vrot.slane %v1063_v16, 4  ;;  %v1082_v21 = vrot.slane %v1063_v16, 6  ;;  %v1103_v23 = vsel %vm1041_vm3, %v1062_v52, %v1080_v17 }
 0x1f4   : > { %v932_v20 = vsub.f32 %v4540_v43, %v926_v18  ;;  %v1012_v25 = vrot.slane %v968_v19, 6  ;;  %v2806_v28 = vrot.slane %v968_v19, 10 }
 0x1f5   : > { %v1106_v24 = vsel %vm1089_vm4, %v1081_v58, %v1082_v21 }
 0x1f6   : > { %v942_v22 = vmul.f32 %v4542_v53, %v932_v20  ;;  %v1107_v62 = vsel %vm842_vm1, %v1103_v23, %v1106_v24  ;;  %v1024_v29 = vrot.slane %v1012_v25, 6 }
 0x1f7   : > { %1121 = vst [vmem:[#allocation2 + $0x10] sm:$0xff] %v1107_v62 }
 0x1f8   : > { %v948_v26 = vadd.f32 %v4545_v57, %v942_v22 }
 0x1fa   : > { %v952_v27 = vmax.f32 %v948_v26, 0.0 }
 0x1fc   : > { %v991_v30 = vrot.slane %v952_v27, 2  ;;  %v993_v31 = vrot.slane %v952_v27, 4  ;;  %v995_v43 = vrot.slane %v952_v27, 6  ;;  %v1054_v32 = vsel %vm1041_vm3, %v952_v27, %v1012_v25 }
 0x1fe   : > { %v1055_v53 = vsel %vm1041_vm3, %v991_v30, %v968_v19  ;;  %v1056_v33 = vsel %vm1041_vm3, %v993_v31, %v2806_v28  ;;  %v1057_v34 = vsel %vm1041_vm3, %v995_v43, %v1024_v29 }
 0x1ff   : > { %v1064_v35 = vpack.c.bf16 %v1055_v53, %v1054_v32  ;;  %v1065_v36 = vpack.c.bf16 %v1057_v34, %v1056_v33 }
 0x201   : > { %v1083_v37 = vrot.slane %v1064_v35, 2  ;;  %v1084_v38 = vrot.slane %v1065_v36, 4  ;;  %v1085_v57 = vrot.slane %v1065_v36, 6 }
 0x203   : > { %v1110_v39 = vsel %vm1041_vm3, %v1064_v35, %v1083_v37  ;;  %v1113_v40 = vsel %vm1089_vm4, %v1084_v38, %v1085_v57 }
 0x204   : > { %v1114_v41 = vsel %vm842_vm1, %v1110_v39, %v1113_v40 }
 0x205   : > { %1122 = vst [vmem:[#allocation2 + $0x18] sm:$0xff] %v1114_v41 }
 0x206 PF: > { %v3035_v42 = vld [vmem:[%s4142_s28 + $0x1c0] sm:$0xf]  ;;  %v3390_v49 = vld [vmem:[%s4142_s28 + $0x1c4] sm:$0xf]  ;;  %s5099_s3 = sld [smem:[#allocation20_spill]]  ;;  %vm2131_vm5 = vcmask 1043456  }
 0x207   : > { %v3394_v44 = vld [vmem:[%s4142_s28 + $0x1dc] sm:$0xf0]  ;;  %v3037_v50 = vld [vmem:[%s4142_s28 + $0x1e0] sm:$0xf0] }
 0x208   : > { %v3291_v45 = vld [vmem:[%s4142_s28 + $0x3c0] sm:$0xf]  ;;  %v3036_v46 = vor.u32 %v3394_v44, %v3035_v42  ;;  %v3040_v54 = vor.u32 %v3390_v49, %v3037_v50  ;;  %v3454_v51 = vld [vmem:[%s4142_s28 + $0x3c4] sm:$0xf] }
 0x209   : > { %v3458_v48 = vld [vmem:[%s4142_s28 + $0x3dc] sm:$0xf0]  ;;  %v3293_v55 = vld [vmem:[%s4142_s28 + $0x3e0] sm:$0xf0] }
 0x20a   : > { %v3292_v47 = vor.u32 %v3458_v48, %v3291_v45  ;;  %v3003_v56 = vld [vmem:[%s4142_s28 + $0x180] sm:$0xf]  ;;  %1911 = vmatpush.bf16.msra.mxu0 %v3036_v46  ;;  %v3296_v59 = vor.u32 %v3454_v51, %v3293_v55  ;;  %1937 = vmatpush.bf16.msra.mxu2 %v3040_v54  ;;  %v3382_v2 = vld [vmem:[%s4142_s28 + $0x184] sm:$0xf] }
 0x20b   : > { %v3386_v60 = vld [vmem:[%s4142_s28 + $0x19c] sm:$0xf0]  ;;  %v3005_v3 = vld [vmem:[%s4142_s28 + $0x1a0] sm:$0xf0] }
 0x20c   : > { %v3259_v61 = vld [vmem:[%s4142_s28 + $0x380] sm:$0xf]  ;;  %1924 = vmatpush.bf16.msra.mxu1 %v3292_v47  ;;  %v3004_v0 = vor.u32 %v3386_v60, %v3003_v56  ;;  %v3446_v4 = vld [vmem:[%s4142_s28 + $0x384] sm:$0xf]  ;;  %1950 = vmatpush.bf16.msra.mxu3 %v3296_v59  ;;  %v3008_v5 = vor.u32 %v3382_v2, %v3005_v3  ;;  %s2807_s16 = sshll.u32 %s5099_s3, 8  ;;  %p3321_p6 = scmp.ne.s32.totalorder %s5099_s3, 7 }
 0x20d   : > { %v3450_v63 = vld [vmem:[%s4142_s28 + $0x39c] sm:$0xf0]  ;;  %v3261_v6 = vld [vmem:[%s4142_s28 + $0x3a0] sm:$0xf0]  ;;  %s1132_s30 = sshra.s32 %s2807_s16, 7 }
 0x20e   : > { %v3260_v1 = vor.u32 %v3450_v63, %v3259_v61  ;;  %v2971_v7 = vld [vmem:[%s4142_s28 + $0x140] sm:$0xf]  ;;  %v3264_v9 = vor.u32 %v3446_v4, %v3261_v6  ;;  %v3374_v12 = vld [vmem:[%s4142_s28 + $0x144] sm:$0xf]  ;;  %1912 = vmatpush.bf16.msra.mxu0 %v3004_v0  ;;  %1938 = vmatpush.bf16.msra.mxu2 %v3008_v5  ;;  %s2808_s20 = sshll.u32 %s1132_s30, 1 }
 0x20f   : > { %v3378_v8 = vld [vmem:[%s4142_s28 + $0x15c] sm:$0xf0]  ;;  %v2973_v13 = vld [vmem:[%s4142_s28 + $0x160] sm:$0xf0]  ;;  %s1135_s22 = scalar_lea.vmem [#allocation2], %s2808_s20 }
 0x210   : > { %v3227_v10 = vld [vmem:[%s4142_s28 + $0x340] sm:$0xf]  ;;  %v2972_v52 = vor.u32 %v3378_v8, %v2971_v7  ;;  %v3438_v14 = vld [vmem:[%s4142_s28 + $0x344] sm:$0xf]  ;;  %1925 = vmatpush.bf16.msra.mxu1 %v3260_v1  ;;  %v2976_v17 = vor.u32 %v3374_v12, %v2973_v13  ;;  %1951 = vmatpush.bf16.msra.mxu3 %v3264_v9  ;;  %v3043_v12 = vld [vmem:[%s4142_s28 + $0x1c8] sm:$0xf] }
 0x211   : > { %v3442_v11 = vld [vmem:[%s4142_s28 + $0x35c] sm:$0xf0]  ;;  %v3229_v15 = vld [vmem:[%s4142_s28 + $0x360] sm:$0xf0]  ;;  %v3299_v13 = vld [vmem:[%s4142_s28 + $0x3c8] sm:$0xf] }
 0x212   : > { %v3228_v16 = vor.u32 %v3442_v11, %v3227_v10  ;;  %v2939_v18 = vld [vmem:[%s4142_s28 + $0x100] sm:$0xf]  ;;  %v3232_v58 = vor.u32 %v3438_v14, %v3229_v15  ;;  %v3366_v22 = vld [vmem:[%s4142_s28 + $0x104] sm:$0xf]  ;;  %1913 = vmatpush.bf16.msra.mxu0 %v2972_v52  ;;  %1939 = vmatpush.bf16.msra.mxu2 %v2976_v17  ;;  %v3395_v52 = vld [vmem:[%s4142_s28 + $0x1e4] sm:$0xf0] }
 0x213   : > { %v3370_v19 = vld [vmem:[%s4142_s28 + $0x11c] sm:$0xf0]  ;;  %v2941_v23 = vld [vmem:[%s4142_s28 + $0x120] sm:$0xf0]  ;;  %v3459_v15 = vld [vmem:[%s4142_s28 + $0x3e4] sm:$0xf0] }
 0x214   : > { %v3195_v20 = vld [vmem:[%s4142_s28 + $0x300] sm:$0xf]  ;;  %v3430_v24 = vld [vmem:[%s4142_s28 + $0x304] sm:$0xf]  ;;  %v2940_v25 = vor.u32 %v3370_v19, %v2939_v18  ;;  %1926 = vmatpush.bf16.msra.mxu1 %v3228_v16  ;;  %v2944_v27 = vor.u32 %v3366_v22, %v2941_v23  ;;  %1952 = vmatpush.bf16.msra.mxu3 %v3232_v58  ;;  %v3391_v16 = vld [vmem:[%s4142_s28 + $0x1cc] sm:$0xf]  ;;  %v3044_v22 = vor.u32 %v3395_v52, %v3043_v12 }
 0x215   : > { %v3434_v21 = vld [vmem:[%s4142_s28 + $0x31c] sm:$0xf0]  ;;  %v3197_v62 = vld [vmem:[%s4142_s28 + $0x320] sm:$0xf0]  ;;  %v3045_v17 = vld [vmem:[%s4142_s28 + $0x1e8] sm:$0xf0]  ;;  %v3300_v23 = vor.u32 %v3459_v15, %v3299_v13 }
 0x216   : > { %v3196_v26 = vor.u32 %v3434_v21, %v3195_v20  ;;  %v2907_v28 = vld [vmem:[%s4142_s28 + $0xc0] sm:$0xf]  ;;  %v3200_v31 = vor.u32 %v3430_v24, %v3197_v62  ;;  %v3358_v32 = vld [vmem:[%s4142_s28 + $0xc4] sm:$0xf]  ;;  %1914 = vmatpush.bf16.msra.mxu0 %v2940_v25  ;;  %1940 = vmatpush.bf16.msra.mxu2 %v2944_v27  ;;  %v3455_v20 = vld [vmem:[%s4142_s28 + $0x3cc] sm:$0xf]  ;;  %v3048_v24 = vor.u32 %v3391_v16, %v3045_v17 }
 0x217   : > { %v3362_v29 = vld [vmem:[%s4142_s28 + $0xdc] sm:$0xf0]  ;;  %v2909_v53 = vld [vmem:[%s4142_s28 + $0xe0] sm:$0xf0]  ;;  %v3301_v58 = vld [vmem:[%s4142_s28 + $0x3e8] sm:$0xf0] }
 0x218   : > { %v3163_v30 = vld [vmem:[%s4142_s28 + $0x2c0] sm:$0xf]  ;;  %v3422_v33 = vld [vmem:[%s4142_s28 + $0x2c4] sm:$0xf]  ;;  %v2908_v35 = vor.u32 %v3362_v29, %v2907_v28  ;;  %1927 = vmatpush.bf16.msra.mxu1 %v3196_v26  ;;  %v2912_v37 = vor.u32 %v3358_v32, %v2909_v53  ;;  %1953 = vmatpush.bf16.msra.mxu3 %v3200_v31  ;;  %v3011_v62 = vld [vmem:[%s4142_s28 + $0x188] sm:$0xf]  ;;  %v3304_v27 = vor.u32 %v3455_v20, %v3301_v58 }
 0x219   : > { %v3426_v43 = vld [vmem:[%s4142_s28 + $0x2dc] sm:$0xf0]  ;;  %v3165_v34 = vld [vmem:[%s4142_s28 + $0x2e0] sm:$0xf0]  ;;  %v3387_v25 = vld [vmem:[%s4142_s28 + $0x1a4] sm:$0xf0] }
 0x21a   : > { %v3164_v36 = vor.u32 %v3426_v43, %v3163_v30  ;;  %v2875_v38 = vld [vmem:[%s4142_s28 + $0x80] sm:$0xf]  ;;  %v3168_v40 = vor.u32 %v3422_v33, %v3165_v34  ;;  %v3350_v42 = vld [vmem:[%s4142_s28 + $0x84] sm:$0xf]  ;;  %1915 = vmatpush.bf16.msra.mxu0 %v2908_v35  ;;  %1941 = vmatpush.bf16.msra.mxu2 %v2912_v37  ;;  %v3267_v26 = vld [vmem:[%s4142_s28 + $0x388] sm:$0xf]  ;;  %v3012_v32 = vor.u32 %v3387_v25, %v3011_v62 }
 0x21b   : > { %v3354_v57 = vld [vmem:[%s4142_s28 + $0x9c] sm:$0xf0]  ;;  %v2877_v44 = vld [vmem:[%s4142_s28 + $0xa0] sm:$0xf0]  ;;  %v3451_v28 = vld [vmem:[%s4142_s28 + $0x3a4] sm:$0xf0] }
 0x21c   : > { %v3131_v39 = vld [vmem:[%s4142_s28 + $0x280] sm:$0xf]  ;;  %v3414_v45 = vld [vmem:[%s4142_s28 + $0x284] sm:$0xf]  ;;  %v2876_v48 = vor.u32 %v3354_v57, %v2875_v38  ;;  %1928 = vmatpush.bf16.msra.mxu1 %v3164_v36  ;;  %v2880_v50 = vor.u32 %v3350_v42, %v2877_v44  ;;  %1954 = vmatpush.bf16.msra.mxu3 %v3168_v40  ;;  %v3383_v29 = vld [vmem:[%s4142_s28 + $0x18c] sm:$0xf]  ;;  %v3268_v53 = vor.u32 %v3451_v28, %v3267_v26 }
 0x21d   : > { %v3418_v41 = vld [vmem:[%s4142_s28 + $0x29c] sm:$0xf0]  ;;  %v3133_v46 = vld [vmem:[%s4142_s28 + $0x2a0] sm:$0xf0]  ;;  %v3013_v30 = vld [vmem:[%s4142_s28 + $0x1a8] sm:$0xf0] }
 0x21e   : > { %v3132_v49 = vor.u32 %v3418_v41, %v3131_v39  ;;  %v2843_v47 = vld [vmem:[%s4142_s28 + $0x40] sm:$0xf]  ;;  %v3136_v55 = vor.u32 %v3414_v45, %v3133_v46  ;;  %v3342_v59 = vld [vmem:[%s4142_s28 + $0x44] sm:$0xf]  ;;  %1916 = vmatpush.bf16.msra.mxu0 %v2876_v48  ;;  %1942 = vmatpush.bf16.msra.mxu2 %v2880_v50  ;;  %v3447_v31 = vld [vmem:[%s4142_s28 + $0x38c] sm:$0xf]  ;;  %v3016_v33 = vor.u32 %v3383_v29, %v3013_v30 }
 0x21f   : > { %v3346_v54 = vld [vmem:[%s4142_s28 + $0x5c] sm:$0xf0]  ;;  %v2845_v60 = vld [vmem:[%s4142_s28 + $0x60] sm:$0xf0]  ;;  %v3269_v43 = vld [vmem:[%s4142_s28 + $0x3a8] sm:$0xf0] }
 0x220   : > { %v3099_v51 = vld [vmem:[%s4142_s28 + $0x240] sm:$0xf]  ;;  %v3406_v61 = vld [vmem:[%s4142_s28 + $0x244] sm:$0xf]  ;;  %v2844_v0 = vor.u32 %v3346_v54, %v2843_v47  ;;  %1929 = vmatpush.bf16.msra.mxu1 %v3132_v49  ;;  %v2848_v4 = vor.u32 %v3342_v59, %v2845_v60  ;;  %1955 = vmatpush.bf16.msra.mxu3 %v3136_v55  ;;  %v2979_v34 = vld [vmem:[%s4142_s28 + $0x148] sm:$0xf]  ;;  %v3272_v37 = vor.u32 %v3447_v31, %v3269_v43 }
 0x221   : > { %v3410_v56 = vld [vmem:[%s4142_s28 + $0x25c] sm:$0xf0]  ;;  %v3101_v63 = vld [vmem:[%s4142_s28 + $0x260] sm:$0xf0]  ;;  %v3379_v35 = vld [vmem:[%s4142_s28 + $0x164] sm:$0xf0] }
 0x222   : > { %v2811_v1 = vld [vmem:[%s4142_s28] sm:$0xf]  ;;  %v3100_v3 = vor.u32 %v3410_v56, %v3099_v51  ;;  %v3334_v7 = vld [vmem:[%s4142_s28 + $0x4] sm:$0xf]  ;;  %v3104_v8 = vor.u32 %v3406_v61, %v3101_v63  ;;  %1917 = vmatpush.bf16.msra.mxu0 %v2844_v0  ;;  %1943 = vmatpush.bf16.msra.mxu2 %v2848_v4  ;;  %v3235_v36 = vld [vmem:[%s4142_s28 + $0x348] sm:$0xf]  ;;  %v2980_v42 = vor.u32 %v3379_v35, %v2979_v34 }
 0x223   : > { %v3338_v2 = vld [vmem:[%s4142_s28 + $0x1c] sm:$0xf0]  ;;  %v2813_v9 = vld [vmem:[%s4142_s28 + $0x20] sm:$0xf0]  ;;  %v3443_v38 = vld [vmem:[%s4142_s28 + $0x364] sm:$0xf0] }
 0x224   : > { %v3067_v5 = vld [vmem:[%s4142_s28 + $0x200] sm:$0xf]  ;;  %v3398_v10 = vld [vmem:[%s4142_s28 + $0x204] sm:$0xf]  ;;  %v2812_v14 = vor.u32 %v3338_v2, %v2811_v1  ;;  %1930 = vmatpush.bf16.msra.mxu1 %v3100_v3  ;;  %v2816_v19 = vor.u32 %v3334_v7, %v2813_v9  ;;  %1956 = vmatpush.bf16.msra.mxu3 %v3104_v8  ;;  %v3375_v57 = vld [vmem:[%s4142_s28 + $0x14c] sm:$0xf]  ;;  %v3236_v46 = vor.u32 %v3443_v38, %v3235_v36 }
 0x225   : > { %v3402_v6 = vld [vmem:[%s4142_s28 + $0x21c] sm:$0xf0]  ;;  %v3069_v11 = vld [vmem:[%s4142_s28 + $0x220] sm:$0xf0]  ;;  %v2981_v39 = vld [vmem:[%s4142_s28 + $0x168] sm:$0xf0] }
 0x226   : > { %v3068_v18 = vor.u32 %v3402_v6, %v3067_v5  ;;  %v3072_v21 = vor.u32 %v3398_v10, %v3069_v11  ;;  %1918 = vmatpush.bf16.msra.mxu0 %v2812_v14  ;;  %1944 = vmatpush.bf16.msra.mxu2 %v2816_v19  ;;  %v3439_v40 = vld [vmem:[%s4142_s28 + $0x34c] sm:$0xf]  ;;  %v2947_v44 = vld [vmem:[%s4142_s28 + $0x108] sm:$0xf]  ;;  %v2984_v48 = vor.u32 %v3375_v57, %v2981_v39 }
 0x227   : > { %v3237_v41 = vld [vmem:[%s4142_s28 + $0x368] sm:$0xf0]  ;;  %v3371_v45 = vld [vmem:[%s4142_s28 + $0x124] sm:$0xf0] }
 0x228   : > { %1931 = vmatpush.bf16.msra.mxu1 %v3068_v18  ;;  %1957 = vmatpush.bf16.msra.mxu3 %v3072_v21  ;;  %v3203_v49 = vld [vmem:[%s4142_s28 + $0x308] sm:$0xf]  ;;  %v3240_v47 = vor.u32 %v3439_v40, %v3237_v41  ;;  %v3367_v54 = vld [vmem:[%s4142_s28 + $0x10c] sm:$0xf]  ;;  %v2948_v59 = vor.u32 %v3371_v45, %v2947_v44  ;;  %v3051_v41 = vld [vmem:[%s4142_s28 + $0x1d0] sm:$0xf] }
 0x229   : > { %v3435_v50 = vld [vmem:[%s4142_s28 + $0x324] sm:$0xf0]  ;;  %v2949_v51 = vld [vmem:[%s4142_s28 + $0x128] sm:$0xf0]  ;;  %v3307_v44 = vld [vmem:[%s4142_s28 + $0x3d0] sm:$0xf] }
 0x22a   : > { %1963 = vmatpush.bf16.msrb.mxu0 %v3044_v22  ;;  %1989 = vmatpush.bf16.msrb.mxu2 %v3048_v24  ;;  %v3431_v55 = vld [vmem:[%s4142_s28 + $0x30c] sm:$0xf]  ;;  %v2915_v60 = vld [vmem:[%s4142_s28 + $0xc8] sm:$0xf]  ;;  %v3204_v63 = vor.u32 %v3435_v50, %v3203_v49  ;;  %v2952_v0 = vor.u32 %v3367_v54, %v2949_v51  ;;  %v3053_v49 = vld [vmem:[%s4142_s28 + $0x1f0] sm:$0xf0] }
 0x22b   : > { %v3205_v56 = vld [vmem:[%s4142_s28 + $0x328] sm:$0xf0]  ;;  %v3363_v1 = vld [vmem:[%s4142_s28 + $0xe4] sm:$0xf0]  ;;  %v3456_v54 = vld [vmem:[%s4142_s28 + $0x3d4] sm:$0xf] }
 0x22c   : > { %1976 = vmatpush.bf16.msrb.mxu1 %v3300_v23  ;;  %2002 = vmatpush.bf16.msrb.mxu3 %v3304_v27  ;;  %v1136_v61 = vld [vmem:[%s1135_s22] sm:$0xf]  ;;  %v3171_v2 = vld [vmem:[%s4142_s28 + $0x2c8] sm:$0xf]  ;;  %v3208_v3 = vor.u32 %v3431_v55, %v3205_v56  ;;  %v2916_v9 = vor.u32 %v3363_v1, %v2915_v60  ;;  %v3309_v51 = vld [vmem:[%s4142_s28 + $0x3f0] sm:$0xf0] }
 0x22d   : > { %1266 = vst [vmem:[#allocation1] ss:$4 sm:$0xff] %v1136_v61  ;;  %v3427_v4 = vld [vmem:[%s4142_s28 + $0x2e4] sm:$0xf0]  ;;  %v3359_v5 = vld [vmem:[%s4142_s28 + $0xcc] sm:$0xf]  ;;  %v3312_v1 = vor.u32 %v3456_v54, %v3309_v51 }
 0x22e   : > { %1964 = vmatpush.bf16.msrb.mxu0 %v3012_v32  ;;  %1990 = vmatpush.bf16.msrb.mxu2 %v3016_v33  ;;  %v2917_v6 = vld [vmem:[%s4142_s28 + $0xe8] sm:$0xf0]  ;;  %v3172_v10 = vor.u32 %v3427_v4, %v3171_v2  ;;  %v2883_v12 = vld [vmem:[%s4142_s28 + $0x88] sm:$0xf]  ;;  %v3019_v61 = vld [vmem:[%s4142_s28 + $0x190] sm:$0xf] }
 0x22f   : > { %v3423_v7 = vld [vmem:[%s4142_s28 + $0x2cc] sm:$0xf]  ;;  %v2920_v11 = vor.u32 %v3359_v5, %v2917_v6  ;;  %v3355_v52 = vld [vmem:[%s4142_s28 + $0xa4] sm:$0xf0]  ;;  %v3452_v2 = vld [vmem:[%s4142_s28 + $0x3ac] sm:$0xf0] }
 0x230   : > { %1977 = vmatpush.bf16.msrb.mxu1 %v3268_v53  ;;  %2003 = vmatpush.bf16.msrb.mxu3 %v3272_v37  ;;  %v3173_v8 = vld [vmem:[%s4142_s28 + $0x2e8] sm:$0xf0]  ;;  %v3139_v13 = vld [vmem:[%s4142_s28 + $0x288] sm:$0xf]  ;;  %v2884_v20 = vor.u32 %v3355_v52, %v2883_v12  ;;  %v3021_v4 = vld [vmem:[%s4142_s28 + $0x1b0] sm:$0xf0] }
 0x231   : > { %v3176_v14 = vor.u32 %v3423_v7, %v3173_v8  ;;  %v3419_v15 = vld [vmem:[%s4142_s28 + $0x2a4] sm:$0xf0]  ;;  %v3351_v16 = vld [vmem:[%s4142_s28 + $0x8c] sm:$0xf]  ;;  %v3448_v5 = vld [vmem:[%s4142_s28 + $0x394] sm:$0xf] }
 0x232   : > { %1965 = vmatpush.bf16.msrb.mxu0 %v2980_v42  ;;  %1991 = vmatpush.bf16.msrb.mxu2 %v2984_v48  ;;  %v2885_v17 = vld [vmem:[%s4142_s28 + $0xa8] sm:$0xf0]  ;;  %v3140_v22 = vor.u32 %v3419_v15, %v3139_v13  ;;  %v2851_v24 = vld [vmem:[%s4142_s28 + $0x48] sm:$0xf]  ;;  %v3396_v42 = vld [vmem:[%s4142_s28 + $0x1ec] sm:$0xf0] }
 0x233   : > { %v3415_v18 = vld [vmem:[%s4142_s28 + $0x28c] sm:$0xf]  ;;  %v2888_v23 = vor.u32 %v3351_v16, %v2885_v17  ;;  %v3347_v62 = vld [vmem:[%s4142_s28 + $0x64] sm:$0xf0]  ;;  %v3392_v48 = vld [vmem:[%s4142_s28 + $0x1d4] sm:$0xf]  ;;  %v3052_v56 = vor.u32 %v3396_v42, %v3051_v41 }
 0x234   : > { %1978 = vmatpush.bf16.msrb.mxu1 %v3236_v46  ;;  %2004 = vmatpush.bf16.msrb.mxu3 %v3240_v47  ;;  %v3141_v19 = vld [vmem:[%s4142_s28 + $0x2a8] sm:$0xf0]  ;;  %v4711_v21 = vld.sshfl [vmem:[#allocation1 + $0x8] sm:$0xff pattern:$0x73625140]  ;;  %v2852_v43 = vor.u32 %v3347_v62, %v2851_v24  ;;  %v3056_v60 = vor.u32 %v3392_v48, %v3053_v49 }
 0x235   : > { %v4709_v58 = vld.sshfl [vmem:[#allocation1] sm:$0xff pattern:$0x73625140]  ;;  %v3107_v25 = vld [vmem:[%s4142_s28 + $0x248] sm:$0xf]  ;;  %v3144_v26 = vor.u32 %v3415_v18, %v3141_v19  ;;  %1958 = vmatmul.bf16.vlgmr.msra.gmra.mxu3 %v4711_v21  ;;  %1932 = vmatmul.bf16.vlgmr.msra.gmra.mxu1 %v4711_v21 }
 0x236   : > { %1966 = vmatpush.bf16.msrb.mxu0 %v2948_v59  ;;  %1992 = vmatpush.bf16.msrb.mxu2 %v2952_v0  ;;  %v3411_v27 = vld [vmem:[%s4142_s28 + $0x264] sm:$0xf0]  ;;  %v3343_v28 = vld [vmem:[%s4142_s28 + $0x4c] sm:$0xf]  ;;  %v3460_v46 = vld [vmem:[%s4142_s28 + $0x3ec] sm:$0xf0] }
 0x237   : > { %1945 = vmatmul.bf16.vlgmr.msra.gmra.mxu2 %v4709_v58  ;;  %v2853_v29 = vld [vmem:[%s4142_s28 + $0x68] sm:$0xf0]  ;;  %1919 = vmatmul.bf16.vlgmr.msra.gmra.mxu0 %v4709_v58  ;;  %v2819_v32 = vld [vmem:[%s4142_s28 + $0x8] sm:$0xf]  ;;  %v3108_v33 = vor.u32 %v3411_v27, %v3107_v25  ;;  %v3308_v59 = vor.u32 %v3460_v46, %v3307_v44  ;;  %v3275_v0 = vld [vmem:[%s4142_s28 + $0x390] sm:$0xf] }
 0x238   : > { %1979 = vmatpush.bf16.msrb.mxu1 %v3204_v63  ;;  %2005 = vmatpush.bf16.msrb.mxu3 %v3208_v3  ;;  %v3407_v30 = vld [vmem:[%s4142_s28 + $0x24c] sm:$0xf]  ;;  %v3339_v53 = vld [vmem:[%s4142_s28 + $0x24] sm:$0xf0]  ;;  %v2856_v34 = vor.u32 %v3343_v28, %v2853_v29  ;;  %v3388_v63 = vld [vmem:[%s4142_s28 + $0x1ac] sm:$0xf0]  ;;  %v3276_v8 = vor.u32 %v3452_v2, %v3275_v0 }
 0x239   : > { %v3109_v31 = vld [vmem:[%s4142_s28 + $0x268] sm:$0xf0]  ;;  %v3075_v35 = vld [vmem:[%s4142_s28 + $0x208] sm:$0xf]  ;;  %v2820_v45 = vor.u32 %v3339_v53, %v2819_v32  ;;  %v3384_v3 = vld [vmem:[%s4142_s28 + $0x194] sm:$0xf]  ;;  %v3020_v7 = vor.u32 %v3388_v63, %v3019_v61 }
 0x23a   : > { %1967 = vmatpush.bf16.msrb.mxu0 %v2916_v9  ;;  %1993 = vmatpush.bf16.msrb.mxu2 %v2920_v11  ;;  %v3403_v36 = vld [vmem:[%s4142_s28 + $0x224] sm:$0xf0]  ;;  %v3335_v37 = vld [vmem:[%s4142_s28 + $0xc] sm:$0xf]  ;;  %v3112_v38 = vor.u32 %v3407_v30, %v3109_v31  ;;  %v3277_v6 = vld [vmem:[%s4142_s28 + $0x3b0] sm:$0xf0]  ;;  %v3024_v9 = vor.u32 %v3384_v3, %v3021_v4 }
 0x23b   : > { %v2821_v57 = vld [vmem:[%s4142_s28 + $0x28] sm:$0xf0]  ;;  %v3076_v50 = vor.u32 %v3403_v36, %v3075_v35  ;;  %v3380_v11 = vld [vmem:[%s4142_s28 + $0x16c] sm:$0xf0]  ;;  %v3280_v52 = vor.u32 %v3448_v5, %v3277_v6  ;;  %v2989_v15 = vld [vmem:[%s4142_s28 + $0x170] sm:$0xf0] }
 0x23c   : > { %1980 = vmatpush.bf16.msrb.mxu1 %v3172_v10  ;;  %2006 = vmatpush.bf16.msrb.mxu3 %v3176_v14  ;;  %v3399_v39 = vld [vmem:[%s4142_s28 + $0x20c] sm:$0xf]  ;;  %v2824_v47 = vor.u32 %v3335_v37, %v2821_v57  ;;  %v2987_v10 = vld [vmem:[%s4142_s28 + $0x150] sm:$0xf]  ;;  %v3376_v14 = vld [vmem:[%s4142_s28 + $0x154] sm:$0xf] }
 0x23d   : > { %v3077_v40 = vld [vmem:[%s4142_s28 + $0x228] sm:$0xf0]  ;;  %v3243_v12 = vld [vmem:[%s4142_s28 + $0x350] sm:$0xf]  ;;  %v3440_v16 = vld [vmem:[%s4142_s28 + $0x354] sm:$0xf]  ;;  %v2988_v18 = vor.u32 %v3380_v11, %v2987_v10 }
 0x23e   : > { %1968 = vmatpush.bf16.msrb.mxu0 %v2884_v20  ;;  %1994 = vmatpush.bf16.msrb.mxu2 %v2888_v23  ;;  %v3080_v55 = vor.u32 %v3399_v39, %v3077_v40  ;;  %v3444_v13 = vld [vmem:[%s4142_s28 + $0x36c] sm:$0xf0]  ;;  %v3245_v17 = vld [vmem:[%s4142_s28 + $0x370] sm:$0xf0]  ;;  %v2992_v20 = vor.u32 %v3376_v14, %v2989_v15 }
 0x23f   : > { %v3244_v19 = vor.u32 %v3444_v13, %v3243_v12  ;;  %v3372_v23 = vld [vmem:[%s4142_s28 + $0x12c] sm:$0xf0]  ;;  %v3248_v62 = vor.u32 %v3440_v16, %v3245_v17  ;;  %v2957_v27 = vld [vmem:[%s4142_s28 + $0x130] sm:$0xf0]  ;;  %v3059_v16 = vld [vmem:[%s4142_s28 + $0x1d8] sm:$0xf] }
 0x240   : > { %1981 = vmatpush.bf16.msrb.mxu1 %v3140_v22  ;;  %2007 = vmatpush.bf16.msrb.mxu3 %v3144_v26  ;;  %v2955_v22 = vld [vmem:[%s4142_s28 + $0x110] sm:$0xf]  ;;  %v3368_v26 = vld [vmem:[%s4142_s28 + $0x114] sm:$0xf]  ;;  %v3397_v17 = vld [vmem:[%s4142_s28 + $0x1f4] sm:$0xf0] }
 0x241   : > { %v3211_v24 = vld [vmem:[%s4142_s28 + $0x310] sm:$0xf]  ;;  %v3432_v28 = vld [vmem:[%s4142_s28 + $0x314] sm:$0xf]  ;;  %v2956_v30 = vor.u32 %v3372_v23, %v2955_v22  ;;  %v3393_v22 = vld [vmem:[%s4142_s28 + $0x1dc] sm:$0xf] }
 0x242   : > { %1969 = vmatpush.bf16.msrb.mxu0 %v2852_v43  ;;  %1995 = vmatpush.bf16.msrb.mxu2 %v2856_v34  ;;  %v3436_v25 = vld [vmem:[%s4142_s28 + $0x32c] sm:$0xf0]  ;;  %v3213_v29 = vld [vmem:[%s4142_s28 + $0x330] sm:$0xf0]  ;;  %v2960_v43 = vor.u32 %v3368_v26, %v2957_v27  ;;  %v3061_v23 = vld [vmem:[%s4142_s28 + $0x1f8] sm:$0xf0] }
 0x243   : > { %v3212_v31 = vor.u32 %v3436_v25, %v3211_v24  ;;  %v2923_v32 = vld [vmem:[%s4142_s28 + $0xd0] sm:$0xf]  ;;  %v3216_v34 = vor.u32 %v3432_v28, %v3213_v29  ;;  %v3360_v36 = vld [vmem:[%s4142_s28 + $0xd4] sm:$0xf]  ;;  %v3457_v25 = vld [vmem:[%s4142_s28 + $0x3dc] sm:$0xf]  ;;  %v3060_v28 = vor.u32 %v3397_v17, %v3059_v16 }
 0x244   : > { %1982 = vmatpush.bf16.msrb.mxu1 %v3108_v33  ;;  %2008 = vmatpush.bf16.msrb.mxu3 %v3112_v38  ;;  %v3364_v53 = vld [vmem:[%s4142_s28 + $0xec] sm:$0xf0]  ;;  %v2925_v37 = vld [vmem:[%s4142_s28 + $0xf0] sm:$0xf0]  ;;  %v3317_v26 = vld [vmem:[%s4142_s28 + $0x3f8] sm:$0xf0] }
 0x245   : > { %v3179_v33 = vld [vmem:[%s4142_s28 + $0x2d0] sm:$0xf]  ;;  %v3424_v38 = vld [vmem:[%s4142_s28 + $0x2d4] sm:$0xf]  ;;  %v2924_v39 = vor.u32 %v3364_v53, %v2923_v32  ;;  %v2928_v41 = vor.u32 %v3360_v36, %v2925_v37  ;;  %v3283_v32 = vld [vmem:[%s4142_s28 + $0x398] sm:$0xf]  ;;  %v3320_v53 = vor.u32 %v3457_v25, %v3317_v26 }
 0x246   : > { %1970 = vmatpush.bf16.msrb.mxu0 %v2820_v45  ;;  %1996 = vmatpush.bf16.msrb.mxu2 %v2824_v47  ;;  %v3428_v35 = vld [vmem:[%s4142_s28 + $0x2ec] sm:$0xf0]  ;;  %v3181_v57 = vld [vmem:[%s4142_s28 + $0x2f0] sm:$0xf0]  ;;  %v3449_v36 = vld [vmem:[%s4142_s28 + $0x39c] sm:$0xf] }
 0x247   : > { %v3180_v40 = vor.u32 %v3428_v35, %v3179_v33  ;;  %v2891_v42 = vld [vmem:[%s4142_s28 + $0x90] sm:$0xf]  ;;  %v3184_v46 = vor.u32 %v3424_v38, %v3181_v57  ;;  %v3352_v49 = vld [vmem:[%s4142_s28 + $0x94] sm:$0xf]  ;;  %v3453_v33 = vld [vmem:[%s4142_s28 + $0x3b4] sm:$0xf0] }
 0x248   : > { %1983 = vmatpush.bf16.msrb.mxu1 %v3076_v50  ;;  %2009 = vmatpush.bf16.msrb.mxu3 %v3080_v55  ;;  %v3356_v44 = vld [vmem:[%s4142_s28 + $0xac] sm:$0xf0]  ;;  %v2893_v50 = vld [vmem:[%s4142_s28 + $0xb0] sm:$0xf0]  ;;  %v3029_v35 = vld [vmem:[%s4142_s28 + $0x1b8] sm:$0xf0]  ;;  %v3284_v57 = vor.u32 %v3453_v33, %v3283_v32 }
 0x249   : > { %1997 = vmatmul.bf16.vlgmr.msrb.gmra.mxu2 %v4709_v58  ;;  %1971 = vmatmul.bf16.vlgmr.msrb.gmra.mxu0 %v4709_v58  ;;  %v3147_v45 = vld [vmem:[%s4142_s28 + $0x290] sm:$0xf]  ;;  %v3416_v47 = vld [vmem:[%s4142_s28 + $0x294] sm:$0xf]  ;;  %v2892_v51 = vor.u32 %v3356_v44, %v2891_v42  ;;  %v3285_v37 = vld [vmem:[%s4142_s28 + $0x3b8] sm:$0xf0] }
 0x24a   : > { %2015 = vmatpush.bf16.msra.mxu0 %v3052_v56  ;;  %2041 = vmatpush.bf16.msra.mxu2 %v3056_v60  ;;  %v3420_v48 = vld [vmem:[%s4142_s28 + $0x2ac] sm:$0xf0]  ;;  %v3149_v54 = vld [vmem:[%s4142_s28 + $0x2b0] sm:$0xf0]  ;;  %v2896_v56 = vor.u32 %v3352_v49, %v2893_v50  ;;  %v3251_v42 = vld [vmem:[%s4142_s28 + $0x358] sm:$0xf]  ;;  %v3288_v44 = vor.u32 %v3449_v36, %v3285_v37 }
 0x24b   : > { %2010 = vmatmul.bf16.vlgmr.msrb.gmra.mxu3 %v4711_v21  ;;  %1984 = vmatmul.bf16.vlgmr.msrb.gmra.mxu1 %v4711_v21  ;;  %v3148_v55 = vor.u32 %v3420_v48, %v3147_v45  ;;  %v3348_v60 = vld [vmem:[%s4142_s28 + $0x6c] sm:$0xf0]  ;;  %v3152_v63 = vor.u32 %v3416_v47, %v3149_v54  ;;  %v2861_v2 = vld [vmem:[%s4142_s28 + $0x70] sm:$0xf0]  ;;  %v3445_v45 = vld [vmem:[%s4142_s28 + $0x374] sm:$0xf0] }
 0x24c   : > { %2028 = vmatpush.bf16.msra.mxu1 %v3308_v59  ;;  %2054 = vmatpush.bf16.msra.mxu3 %v3312_v1  ;;  %v2859_v59 = vld [vmem:[%s4142_s28 + $0x50] sm:$0xf]  ;;  %v3344_v1 = vld [vmem:[%s4142_s28 + $0x54] sm:$0xf]  ;;  %v2997_v48 = vld [vmem:[%s4142_s28 + $0x178] sm:$0xf0]  ;;  %v3252_v54 = vor.u32 %v3445_v45, %v3251_v42 }
 0x24d   : > { %v3115_v61 = vld [vmem:[%s4142_s28 + $0x250] sm:$0xf]  ;;  %v3408_v3 = vld [vmem:[%s4142_s28 + $0x254] sm:$0xf]  ;;  %v2860_v5 = vor.u32 %v3348_v60, %v2859_v59  ;;  %v3441_v49 = vld [vmem:[%s4142_s28 + $0x35c] sm:$0xf] }
 0x24e   : > { %2016 = vmatpush.bf16.msra.mxu0 %v3020_v7  ;;  %2042 = vmatpush.bf16.msra.mxu2 %v3024_v9  ;;  %v3412_v0 = vld [vmem:[%s4142_s28 + $0x26c] sm:$0xf0]  ;;  %v3117_v4 = vld [vmem:[%s4142_s28 + $0x270] sm:$0xf0]  ;;  %v2864_v9 = vor.u32 %v3344_v1, %v2861_v2  ;;  %v3253_v50 = vld [vmem:[%s4142_s28 + $0x378] sm:$0xf0] }
 0x24f   : > { %v2827_v6 = vld [vmem:[%s4142_s28 + $0x10] sm:$0xf]  ;;  %v3336_v12 = vld [vmem:[%s4142_s28 + $0x14] sm:$0xf]  ;;  %v3219_v59 = vld [vmem:[%s4142_s28 + $0x318] sm:$0xf]  ;;  %v3256_v60 = vor.u32 %v3441_v49, %v3253_v50 }
 0x250   : > { %2029 = vmatpush.bf16.msra.mxu1 %v3276_v8  ;;  %2055 = vmatpush.bf16.msra.mxu3 %v3280_v52  ;;  %v3340_v7 = vld [vmem:[%s4142_s28 + $0x2c] sm:$0xf0]  ;;  %v3116_v8 = vor.u32 %v3412_v0, %v3115_v61  ;;  %v3120_v52 = vor.u32 %v3408_v3, %v3117_v4  ;;  %v2829_v13 = vld [vmem:[%s4142_s28 + $0x30] sm:$0xf0]  ;;  %v3437_v61 = vld [vmem:[%s4142_s28 + $0x334] sm:$0xf0] }
 0x251   : > { %v3083_v10 = vld [vmem:[%s4142_s28 + $0x210] sm:$0xf]  ;;  %v3400_v14 = vld [vmem:[%s4142_s28 + $0x214] sm:$0xf]  ;;  %v2965_v0 = vld [vmem:[%s4142_s28 + $0x138] sm:$0xf0]  ;;  %v3220_v4 = vor.u32 %v3437_v61, %v3219_v59 }
 0x252   : > { %2017 = vmatpush.bf16.msra.mxu0 %v2988_v18  ;;  %2043 = vmatpush.bf16.msra.mxu2 %v2992_v20  ;;  %v3404_v11 = vld [vmem:[%s4142_s28 + $0x22c] sm:$0xf0]  ;;  %v3085_v15 = vld [vmem:[%s4142_s28 + $0x230] sm:$0xf0]  ;;  %v3315_v18 = vld [vmem:[%s4142_s28 + $0x3d8] sm:$0xf] }
 0x253   : > { %v3461_v20 = vld [vmem:[%s4142_s28 + $0x3f4] sm:$0xf0]  ;;  %v3084_v24 = vor.u32 %v3404_v11, %v3083_v10  ;;  %v3088_v27 = vor.u32 %v3400_v14, %v3085_v15  ;;  %v3433_v1 = vld [vmem:[%s4142_s28 + $0x31c] sm:$0xf] }
 0x254   : > { %2030 = vmatpush.bf16.msra.mxu1 %v3244_v19  ;;  %2056 = vmatpush.bf16.msra.mxu3 %v3248_v62  ;;  %v2828_v19 = vor.u32 %v3340_v7, %v2827_v6  ;;  %v2832_v62 = vor.u32 %v3336_v12, %v2829_v13  ;;  %v3316_v29 = vor.u32 %v3461_v20, %v3315_v18  ;;  %v3221_v2 = vld [vmem:[%s4142_s28 + $0x338] sm:$0xf0]  ;;  %v2931_v6 = vld [vmem:[%s4142_s28 + $0xd8] sm:$0xf] }
 0x255   : > { %v3365_v7 = vld [vmem:[%s4142_s28 + $0xf4] sm:$0xf0]  ;;  %v3361_v11 = vld [vmem:[%s4142_s28 + $0xdc] sm:$0xf] }
 0x256   : > { %2018 = vmatpush.bf16.msra.mxu0 %v2956_v30  ;;  %2044 = vmatpush.bf16.msra.mxu2 %v2960_v43  ;;  %v3064_v30 = vor.u32 %v3393_v22, %v3061_v23  ;;  %v3389_v43 = vld [vmem:[%s4142_s28 + $0x1b4] sm:$0xf0]  ;;  %v2933_v12 = vld [vmem:[%s4142_s28 + $0xf8] sm:$0xf0]  ;;  %v2932_v14 = vor.u32 %v3365_v7, %v2931_v6 }
 0x257   : > { %v3429_v10 = vld [vmem:[%s4142_s28 + $0x2f4] sm:$0xf0]  ;;  %v3189_v13 = vld [vmem:[%s4142_s28 + $0x2f8] sm:$0xf0]  ;;  %v2936_v16 = vor.u32 %v3361_v11, %v2933_v12 }
 0x258   : > { %2031 = vmatpush.bf16.msra.mxu1 %v3212_v31  ;;  %2057 = vmatpush.bf16.msra.mxu3 %v3216_v34  ;;  %v3027_v31 = vld [vmem:[%s4142_s28 + $0x198] sm:$0xf]  ;;  %v3385_v34 = vld [vmem:[%s4142_s28 + $0x19c] sm:$0xf] }
 0x259   : > { %v3028_v38 = vor.u32 %v3389_v43, %v3027_v31  ;;  %v2899_v17 = vld [vmem:[%s4142_s28 + $0x98] sm:$0xf]  ;;  %v3353_v23 = vld [vmem:[%s4142_s28 + $0x9c] sm:$0xf] }
 0x25a   : > { %2019 = vmatpush.bf16.msra.mxu0 %v2924_v39  ;;  %2045 = vmatpush.bf16.msra.mxu2 %v2928_v41  ;;  %v3032_v39 = vor.u32 %v3385_v34, %v3029_v35  ;;  %v3381_v41 = vld [vmem:[%s4142_s28 + $0x174] sm:$0xf0]  ;;  %v3157_v25 = vld [vmem:[%s4142_s28 + $0x2b8] sm:$0xf0] }
 0x25b   : > { %v3357_v18 = vld [vmem:[%s4142_s28 + $0xb4] sm:$0xf0]  ;;  %v2869_v33 = vld [vmem:[%s4142_s28 + $0x78] sm:$0xf0] }
 0x25c   : > { %2032 = vmatpush.bf16.msra.mxu1 %v3180_v40  ;;  %2058 = vmatpush.bf16.msra.mxu3 %v3184_v46  ;;  %v2995_v40 = vld [vmem:[%s4142_s28 + $0x158] sm:$0xf]  ;;  %v3377_v46 = vld [vmem:[%s4142_s28 + $0x15c] sm:$0xf]  ;;  %v2900_v26 = vor.u32 %v3357_v18, %v2899_v17 }
 0x25d   : > { %v2996_v47 = vor.u32 %v3381_v41, %v2995_v40  ;;  %v3421_v22 = vld [vmem:[%s4142_s28 + $0x2b4] sm:$0xf0]  ;;  %v3409_v34 = vld [vmem:[%s4142_s28 + $0x25c] sm:$0xf] }
 0x25e   : > { %2020 = vmatpush.bf16.msra.mxu0 %v2892_v51  ;;  %2046 = vmatpush.bf16.msra.mxu2 %v2896_v56  ;;  %v3000_v51 = vor.u32 %v3377_v46, %v2997_v48  ;;  %v3373_v56 = vld [vmem:[%s4142_s28 + $0x134] sm:$0xf0]  ;;  %v3125_v35 = vld [vmem:[%s4142_s28 + $0x278] sm:$0xf0] }
 0x25f   : > { %v3123_v31 = vld [vmem:[%s4142_s28 + $0x258] sm:$0xf]  ;;  %v3128_v41 = vor.u32 %v3409_v34, %v3125_v35  ;;  %v2837_v45 = vld [vmem:[%s4142_s28 + $0x38] sm:$0xf0] }
 0x260   : > { %2033 = vmatpush.bf16.msra.mxu1 %v3148_v55  ;;  %2059 = vmatpush.bf16.msra.mxu3 %v3152_v63  ;;  %v2963_v55 = vld [vmem:[%s4142_s28 + $0x118] sm:$0xf]  ;;  %v3369_v63 = vld [vmem:[%s4142_s28 + $0x11c] sm:$0xf] }
 0x261   : > { %v2964_v3 = vor.u32 %v3373_v56, %v2963_v55  ;;  %v3413_v32 = vld [vmem:[%s4142_s28 + $0x274] sm:$0xf0]  ;;  %v3401_v46 = vld [vmem:[%s4142_s28 + $0x21c] sm:$0xf] }
 0x262   : > { %2021 = vmatpush.bf16.msra.mxu0 %v2860_v5  ;;  %2047 = vmatpush.bf16.msra.mxu2 %v2864_v9  ;;  %v2968_v5 = vor.u32 %v3369_v63, %v2965_v0  ;;  %v3224_v9 = vor.u32 %v3433_v1, %v3221_v2  ;;  %v3124_v37 = vor.u32 %v3413_v32, %v3123_v31  ;;  %v3091_v40 = vld [vmem:[%s4142_s28 + $0x218] sm:$0xf]  ;;  %v3093_v48 = vld [vmem:[%s4142_s28 + $0x238] sm:$0xf0]  ;;  %v1128_v0 = vld [vmem:[#allocation3 + $0x10] sm:$0xff] }
 0x263   : > { %v3405_v42 = vld [vmem:[%s4142_s28 + $0x234] sm:$0xf0] }
 0x264   : > { %2034 = vmatpush.bf16.msra.mxu1 %v3116_v8  ;;  %2060 = vmatpush.bf16.msra.mxu3 %v3120_v52  ;;  %v3187_v8 = vld [vmem:[%s4142_s28 + $0x2d8] sm:$0xf]  ;;  %v3425_v52 = vld [vmem:[%s4142_s28 + $0x2dc] sm:$0xf]  ;;  %v3092_v50 = vor.u32 %v3405_v42, %v3091_v40 }
 0x265   : > { %v3188_v15 = vor.u32 %v3429_v10, %v3187_v8  ;;  %v3192_v20 = vor.u32 %v3425_v52, %v3189_v13  ;;  %v1129_v52 = vld [vmem:[#allocation3] sm:$0xff] }
 0x266   : > { %2022 = vmatpush.bf16.msra.mxu0 %v2828_v19  ;;  %2048 = vmatpush.bf16.msra.mxu2 %v2832_v62  ;;  %v3155_v19 = vld [vmem:[%s4142_s28 + $0x298] sm:$0xf]  ;;  %v3417_v62 = vld [vmem:[%s4142_s28 + $0x29c] sm:$0xf] }
 0x267   : > { %v3160_v43 = vor.u32 %v3417_v62, %v3157_v25  ;;  %v1130_v25 = vld [vmem:[#allocation3 + $0x18] sm:$0xff] }
 0x268   : > { %2035 = vmatpush.bf16.msra.mxu1 %v3084_v24  ;;  %2061 = vmatpush.bf16.msra.mxu3 %v3088_v27  ;;  %v2901_v24 = vld [vmem:[%s4142_s28 + $0xb8] sm:$0xf0]  ;;  %v3156_v27 = vor.u32 %v3421_v22, %v3155_v19 }
 0x269   : > { %2049 = vmatmul.bf16.vlgmr.msra.gmra.mxu2 %v4709_v58  ;;  %2023 = vmatmul.bf16.vlgmr.msra.gmra.mxu0 %v4709_v58 }
 0x26a   : > { %2067 = vmatpush.bf16.msrb.mxu0 %v3060_v28  ;;  %2093 = vmatpush.bf16.msrb.mxu2 %v3064_v30  ;;  %v2904_v28 = vor.u32 %v3353_v23, %v2901_v24  ;;  %v3349_v30 = vld [vmem:[%s4142_s28 + $0x74] sm:$0xf0] }
 0x26b   : > { %2062 = vmatmul.bf16.vlgmr.msra.gmra.mxu3 %v4711_v21  ;;  %2036 = vmatmul.bf16.vlgmr.msra.gmra.mxu1 %v4711_v21 }
 0x26c   : > { %2080 = vmatpush.bf16.msrb.mxu1 %v3316_v29  ;;  %2106 = vmatpush.bf16.msrb.mxu3 %v3320_v53  ;;  %v2867_v29 = vld [vmem:[%s4142_s28 + $0x58] sm:$0xf]  ;;  %v3345_v53 = vld [vmem:[%s4142_s28 + $0x5c] sm:$0xf] }
 0x26d   : > { %v2868_v36 = vor.u32 %v3349_v30, %v2867_v29 }
 0x26e   : > { %2068 = vmatpush.bf16.msrb.mxu0 %v3028_v38  ;;  %2094 = vmatpush.bf16.msrb.mxu2 %v3032_v39  ;;  %v2872_v38 = vor.u32 %v3345_v53, %v2869_v33  ;;  %v3341_v39 = vld [vmem:[%s4142_s28 + $0x34] sm:$0xf0] }
 0x270   : > { %2081 = vmatpush.bf16.msrb.mxu1 %v3284_v57  ;;  %2107 = vmatpush.bf16.msrb.mxu3 %v3288_v44  ;;  %v2835_v57 = vld [vmem:[%s4142_s28 + $0x18] sm:$0xf]  ;;  %v3337_v44 = vld [vmem:[%s4142_s28 + $0x1c] sm:$0xf] }
 0x271   : > { %v2836_v49 = vor.u32 %v3341_v39, %v2835_v57 }
 0x272   : > { %2069 = vmatpush.bf16.msrb.mxu0 %v2996_v47  ;;  %2095 = vmatpush.bf16.msrb.mxu2 %v3000_v51  ;;  %v2840_v47 = vor.u32 %v3337_v44, %v2837_v45 }
 0x274   : > { %2082 = vmatpush.bf16.msrb.mxu1 %v3252_v54  ;;  %2108 = vmatpush.bf16.msrb.mxu3 %v3256_v60  ;;  %v3096_v54 = vor.u32 %v3401_v46, %v3093_v48 }
 0x276   : > { %2070 = vmatpush.bf16.msrb.mxu0 %v2964_v3  ;;  %2096 = vmatpush.bf16.msrb.mxu2 %v2968_v5 }
 0x278   : > { %2083 = vmatpush.bf16.msrb.mxu1 %v3220_v4  ;;  %2109 = vmatpush.bf16.msrb.mxu3 %v3224_v9 }
 0x27a   : > { %2071 = vmatpush.bf16.msrb.mxu0 %v2932_v14  ;;  %2097 = vmatpush.bf16.msrb.mxu2 %v2936_v16 }
 0x27c   : > { %2084 = vmatpush.bf16.msrb.mxu1 %v3188_v15  ;;  %2110 = vmatpush.bf16.msrb.mxu3 %v3192_v20 }
 0x27e   : > { %2072 = vmatpush.bf16.msrb.mxu0 %v2900_v26  ;;  %2098 = vmatpush.bf16.msrb.mxu2 %v2904_v28 }
 0x280   : > { %2085 = vmatpush.bf16.msrb.mxu1 %v3156_v27  ;;  %2111 = vmatpush.bf16.msrb.mxu3 %v3160_v43 }
 0x282   : > { %2073 = vmatpush.bf16.msrb.mxu0 %v2868_v36  ;;  %2099 = vmatpush.bf16.msrb.mxu2 %v2872_v38  ;;  %v1131_v38 = vld [vmem:[#allocation3 + $0x8] sm:$0xff] }
 0x284   : > { %2086 = vmatpush.bf16.msrb.mxu1 %v3124_v37  ;;  %2112 = vmatpush.bf16.msrb.mxu3 %v3128_v41 }
 0x286   : > { %2074 = vmatpush.bf16.msrb.mxu0 %v2836_v49  ;;  %2100 = vmatpush.bf16.msrb.mxu2 %v2840_v47 }
 0x288   : > { %2087 = vmatpush.bf16.msrb.mxu1 %v3092_v50  ;;  %2113 = vmatpush.bf16.msrb.mxu3 %v3096_v54 }
 0x289   : > { %2075 = vmatmul.bf16.vlgmr.msrb.gmra.mxu0 %v4709_v58  ;;  %2101 = vmatmul.bf16.vlgmr.msrb.gmra.mxu2 %v4709_v58 }
 0x28b   : > { %2088 = vmatmul.bf16.vlgmr.msrb.gmra.mxu1 %v4711_v21  ;;  %2114 = vmatmul.bf16.vlgmr.msrb.gmra.mxu3 %v4711_v21 }
 0x2b2   : > { %v1933_v55 = vpop.f32.mrf.mxu1 }
 0x2b4   : > { %v1920_v51 = vpop.f32.mrf.mxu0 }
 0x2b5   : > { %v1934_v60 = vadd.f32 %v1933_v55, %v1920_v51 }
 0x2b8   : > { %v1959_v59 = vpop.f32.mrf.mxu3 }
 0x2ba   : > { %v1946_v56 = vpop.f32.mrf.mxu2  ;;  %v1935_v2 = vpop.f32.mrf.mxu1 }
 0x2bb   : > { %v1960_v61 = vadd.f32 %v1959_v59, %v1946_v56 }
 0x2bc   : > { %v1922_v63 = vpop.f32.mrf.mxu0 }
 0x2bd   : > { %v2127_v1 = vrot.slane %v1960_v61, 4 }
 0x2bf   : > { %v2132_v3 = vsel %vm2131_vm5, %v1934_v60, %v2127_v1 }
 0x2c0   : > { %v2140_v4 = vadd.f32 %v2132_v3, %v1128_v0  ;;  %v1961_v6 = vpop.f32.mrf.mxu3 }
 0x2c2   : > { %v1948_v5 = vpop.f32.mrf.mxu2  ;;  %2144 = vst [vmem:[#allocation3 + $0x10] sm:$0xff] %v2140_v4 }
 0x2c6   : > { %v1972_v58 = vpop.f32.mrf.mxu0 }
 0x2c8   : > { %v1985_v7 = vpop.f32.mrf.mxu1 }
 0x2c9   : > { %v1986_v9 = vadd.f32 %v1985_v7, %v1972_v58 }
 0x2cc   : > { %v1998_v21 = vpop.f32.mrf.mxu2 }
 0x2ce   : > { %v2011_v8 = vpop.f32.mrf.mxu3  ;;  %v1974_v11 = vpop.f32.mrf.mxu0 }
 0x2cf   : > { %v2012_v10 = vadd.f32 %v2011_v8, %v1998_v21 }
 0x2d0   : > { %v1987_v12 = vpop.f32.mrf.mxu1 }
 0x2d1   : > { %v2128_v13 = vrot.slane %v2012_v10, 4 }
 0x2d3   : > { %v2133_v14 = vsel %vm2131_vm5, %v1986_v9, %v2128_v13 }
 0x2d4   : > { %v2000_v15 = vpop.f32.mrf.mxu2  ;;  %v2141_v16 = vadd.f32 %v2133_v14, %v1129_v52 }
 0x2d6   : > { %2145 = vst [vmem:[#allocation3] sm:$0xff] %v2141_v16  ;;  %v2013_v17 = vpop.f32.mrf.mxu3 }
 0x2e6   : > { %v2024_v18 = vpop.f32.mrf.mxu0 }
 0x2e8   : > { %v2037_v19 = vpop.f32.mrf.mxu1 }
 0x2e9   : > { %v2038_v23 = vadd.f32 %v2037_v19, %v2024_v18 }
 0x2ec   : > { %v2050_v20 = vpop.f32.mrf.mxu2 }
 0x2ee   : > { %v2063_v22 = vpop.f32.mrf.mxu3  ;;  %v2026_v62 = vpop.f32.mrf.mxu0 }
 0x2ef   : > { %v2064_v24 = vadd.f32 %v2063_v22, %v2050_v20 }
 0x2f0   : > { %v2039_v27 = vpop.f32.mrf.mxu1 }
 0x2f1   : > { %v2129_v26 = vrot.slane %v2064_v24, 4 }
 0x2f3   : > { %v2134_v28 = vsel %vm2131_vm5, %v2038_v23, %v2129_v26 }
 0x2f4   : > { %v2142_v29 = vadd.f32 %v2134_v28, %v1130_v25  ;;  %v2052_v30 = vpop.f32.mrf.mxu2 }
 0x2f6   : > { %2146 = vst [vmem:[#allocation3 + $0x18] sm:$0xff] %v2142_v29  ;;  %v2065_v31 = vpop.f32.mrf.mxu3 }
 0x306   : > { %v2076_v43 = vpop.f32.mrf.mxu0 }
 0x308   : > { %v2089_v32 = vpop.f32.mrf.mxu1 }
 0x309   : > { %v2090_v37 = vadd.f32 %v2089_v32, %v2076_v43 }
 0x30c   : > { %v2102_v53 = vpop.f32.mrf.mxu2 }
 0x30e   : > { %v2115_v33 = vpop.f32.mrf.mxu3  ;;  %v2078_v34 = vpop.f32.mrf.mxu0 }
 0x30f   : > { %v2116_v35 = vadd.f32 %v2115_v33, %v2102_v53 }
 0x310   : > { %v2091_v36 = vpop.f32.mrf.mxu1 }
 0x311   : > { %v2130_v57 = vrot.slane %v2116_v35, 4 }
 0x312   : > { %2151 = sbr.rel (%p3321_p6) target bundleno = 1004 (0x3ec), region = 80 }
 0x313   : > { %v2135_v39 = vsel %vm2131_vm5, %v2090_v37, %v2130_v57 }
 0x314   : > { %v2143_v40 = vadd.f32 %v2135_v39, %v1131_v38  ;;  %v2104_v41 = vpop.f32.mrf.mxu2 }
 0x316   : > { %2147 = vst [vmem:[#allocation3 + $0x8] sm:$0xff] %v2143_v40  ;;  %v2117_v42 = vpop.f32.mrf.mxu3 }
 0x317   : > { %v2338_v44 = vld [vmem:[%s4155_s8 + $0x2f0] sm:$0xff]  ;;  %v2336_v45 = vld [vmem:[%s4155_s8 + $0x2e0] sm:$0xff]  ;;  %v2339_v41 = vld [vmem:[%s4155_s8 + $0x2f8] sm:$0xff]  ;;  %vm2239_vm6 = vcmask 1041408  }
 0x318   : > { %v2370_v46 = vld [vmem:[%s4155_s8 + $0x3f0] sm:$0xff]  ;;  %2412 = vmatpush.msra.mxu2 %v2338_v44  ;;  %v2368_v47 = vld [vmem:[%s4155_s8 + $0x3e0] sm:$0xff]  ;;  %v2371_v42 = vld [vmem:[%s4155_s8 + $0x3f8] sm:$0xff] }
 0x319   : > { %2432 = vmatpush.msra.mxu3 %v2370_v46  ;;  %v2274_v48 = vld [vmem:[%s4155_s8 + $0xf0] sm:$0xff]  ;;  %v2272_v54 = vld [vmem:[%s4155_s8 + $0xe0] sm:$0xff]  ;;  %v2337_v46 = vld [vmem:[%s4155_s8 + $0x2e8] sm:$0xff] }
 0x31a   : > { %v2306_v49 = vld [vmem:[%s4155_s8 + $0x1f0] sm:$0xff]  ;;  %2372 = vmatpush.msra.mxu0 %v2274_v48  ;;  %v2304_v51 = vld [vmem:[%s4155_s8 + $0x1e0] sm:$0xff]  ;;  %2413 = vmatpush.msra.mxu2 %v2336_v45  ;;  %v2275_v48 = vld [vmem:[%s4155_s8 + $0xf8] sm:$0xff] }
 0x31b   : > { %v2334_v50 = vld [vmem:[%s4155_s8 + $0x2d0] sm:$0xff]  ;;  %2392 = vmatpush.msra.mxu1 %v2306_v49  ;;  %2433 = vmatpush.msra.mxu3 %v2368_v47  ;;  %v2332_v59 = vld [vmem:[%s4155_s8 + $0x2c0] sm:$0xff]  ;;  %v2307_v49 = vld [vmem:[%s4155_s8 + $0x1f8] sm:$0xff] }
 0x31c   : > { %v2366_v55 = vld [vmem:[%s4155_s8 + $0x3d0] sm:$0xff]  ;;  %2373 = vmatpush.msra.mxu0 %v2272_v54  ;;  %v2364_v61 = vld [vmem:[%s4155_s8 + $0x3c0] sm:$0xff]  ;;  %2414 = vmatpush.msra.mxu2 %v2334_v50  ;;  %v2335_v50 = vld [vmem:[%s4155_s8 + $0x2d8] sm:$0xff] }
 0x31d   : > { %v2270_v56 = vld [vmem:[%s4155_s8 + $0xd0] sm:$0xff]  ;;  %2393 = vmatpush.msra.mxu1 %v2304_v51  ;;  %2434 = vmatpush.msra.mxu3 %v2366_v55  ;;  %v2268_v63 = vld [vmem:[%s4155_s8 + $0xc0] sm:$0xff]  ;;  %v2369_v47 = vld [vmem:[%s4155_s8 + $0x3e8] sm:$0xff] }
 0x31e   : > { %v2302_v60 = vld [vmem:[%s4155_s8 + $0x1d0] sm:$0xff]  ;;  %v2300_v0 = vld [vmem:[%s4155_s8 + $0x1c0] sm:$0xff]  ;;  %2374 = vmatpush.msra.mxu0 %v2270_v56  ;;  %2415 = vmatpush.msra.mxu2 %v2332_v59  ;;  %v2273_v54 = vld [vmem:[%s4155_s8 + $0xe8] sm:$0xff] }
 0x31f   : > { %2394 = vmatpush.msra.mxu1 %v2302_v60  ;;  %v2330_v1 = vld [vmem:[%s4155_s8 + $0x2b0] sm:$0xff]  ;;  %2435 = vmatpush.msra.mxu3 %v2364_v61  ;;  %v2328_v5 = vld [vmem:[%s4155_s8 + $0x2a0] sm:$0xff]  ;;  %v2305_v51 = vld [vmem:[%s4155_s8 + $0x1e8] sm:$0xff] }
 0x320   : > { %v2362_v2 = vld [vmem:[%s4155_s8 + $0x3b0] sm:$0xff]  ;;  %2375 = vmatpush.msra.mxu0 %v2268_v63  ;;  %v2360_v6 = vld [vmem:[%s4155_s8 + $0x3a0] sm:$0xff]  ;;  %2416 = vmatpush.msra.mxu2 %v2330_v1  ;;  %v2333_v55 = vld [vmem:[%s4155_s8 + $0x2c8] sm:$0xff] }
 0x321   : > { %v2266_v3 = vld [vmem:[%s4155_s8 + $0xb0] sm:$0xff]  ;;  %2395 = vmatpush.msra.mxu1 %v2300_v0  ;;  %2436 = vmatpush.msra.mxu3 %v2362_v2  ;;  %v2264_v58 = vld [vmem:[%s4155_s8 + $0xa0] sm:$0xff]  ;;  %v2367_v56 = vld [vmem:[%s4155_s8 + $0x3d8] sm:$0xff] }
 0x322   : > { %v2298_v4 = vld [vmem:[%s4155_s8 + $0x1b0] sm:$0xff]  ;;  %v2296_v7 = vld [vmem:[%s4155_s8 + $0x1a0] sm:$0xff]  ;;  %2376 = vmatpush.msra.mxu0 %v2266_v3  ;;  %2417 = vmatpush.msra.mxu2 %v2328_v5  ;;  %v2271_v59 = vld [vmem:[%s4155_s8 + $0xd8] sm:$0xff] }
 0x323   : > { %2396 = vmatpush.msra.mxu1 %v2298_v4  ;;  %v2326_v21 = vld [vmem:[%s4155_s8 + $0x290] sm:$0xff]  ;;  %2437 = vmatpush.msra.mxu3 %v2360_v6  ;;  %v2324_v11 = vld [vmem:[%s4155_s8 + $0x280] sm:$0xff]  ;;  %v2303_v60 = vld [vmem:[%s4155_s8 + $0x1d8] sm:$0xff] }
 0x324   : > { %v2358_v8 = vld [vmem:[%s4155_s8 + $0x390] sm:$0xff]  ;;  %2377 = vmatpush.msra.mxu0 %v2264_v58  ;;  %v2356_v12 = vld [vmem:[%s4155_s8 + $0x380] sm:$0xff]  ;;  %2418 = vmatpush.msra.mxu2 %v2326_v21  ;;  %v2331_v61 = vld [vmem:[%s4155_s8 + $0x2b8] sm:$0xff] }
 0x325   : > { %v2262_v9 = vld [vmem:[%s4155_s8 + $0x90] sm:$0xff]  ;;  %2397 = vmatpush.msra.mxu1 %v2296_v7  ;;  %2438 = vmatpush.msra.mxu3 %v2358_v8  ;;  %v2260_v52 = vld [vmem:[%s4155_s8 + $0x80] sm:$0xff]  ;;  %v2365_v63 = vld [vmem:[%s4155_s8 + $0x3c8] sm:$0xff] }
 0x326   : > { %v2294_v10 = vld [vmem:[%s4155_s8 + $0x190] sm:$0xff]  ;;  %v2292_v13 = vld [vmem:[%s4155_s8 + $0x180] sm:$0xff]  ;;  %2378 = vmatpush.msra.mxu0 %v2262_v9  ;;  %2419 = vmatpush.msra.mxu2 %v2324_v11  ;;  %v2269_v0 = vld [vmem:[%s4155_s8 + $0xc8] sm:$0xff] }
 0x327   : > { %2398 = vmatpush.msra.mxu1 %v2294_v10  ;;  %v2322_v14 = vld [vmem:[%s4155_s8 + $0x270] sm:$0xff]  ;;  %2439 = vmatpush.msra.mxu3 %v2356_v12  ;;  %v2320_v18 = vld [vmem:[%s4155_s8 + $0x260] sm:$0xff]  ;;  %v2301_v7 = vld [vmem:[%s4155_s8 + $0x1c8] sm:$0xff] }
 0x328   : > { %v2354_v15 = vld [vmem:[%s4155_s8 + $0x370] sm:$0xff]  ;;  %2379 = vmatpush.msra.mxu0 %v2260_v52  ;;  %v2352_v19 = vld [vmem:[%s4155_s8 + $0x360] sm:$0xff]  ;;  %2420 = vmatpush.msra.mxu2 %v2322_v14  ;;  %v2363_v21 = vld [vmem:[%s4155_s8 + $0x3b8] sm:$0xff] }
 0x329   : > { %v2258_v16 = vld [vmem:[%s4155_s8 + $0x70] sm:$0xff]  ;;  %2399 = vmatpush.msra.mxu1 %v2292_v13  ;;  %2440 = vmatpush.msra.mxu3 %v2354_v15  ;;  %v2256_v20 = vld [vmem:[%s4155_s8 + $0x60] sm:$0xff]  ;;  %v2329_v11 = vld [vmem:[%s4155_s8 + $0x2a8] sm:$0xff] }
 0x32a   : > { %v2290_v17 = vld [vmem:[%s4155_s8 + $0x170] sm:$0xff]  ;;  %v2288_v22 = vld [vmem:[%s4155_s8 + $0x160] sm:$0xff]  ;;  %2380 = vmatpush.msra.mxu0 %v2258_v16  ;;  %2421 = vmatpush.msra.mxu2 %v2320_v18  ;;  %v2267_v12 = vld [vmem:[%s4155_s8 + $0xb8] sm:$0xff] }
 0x32b   : > { %2400 = vmatpush.msra.mxu1 %v2290_v17  ;;  %v2318_v23 = vld [vmem:[%s4155_s8 + $0x250] sm:$0xff]  ;;  %2441 = vmatpush.msra.mxu3 %v2352_v19  ;;  %v2316_v26 = vld [vmem:[%s4155_s8 + $0x240] sm:$0xff]  ;;  %v2299_v52 = vld [vmem:[%s4155_s8 + $0x1b8] sm:$0xff] }
 0x32c   : > { %v2350_v24 = vld [vmem:[%s4155_s8 + $0x350] sm:$0xff]  ;;  %2381 = vmatpush.msra.mxu0 %v2256_v20  ;;  %v2348_v27 = vld [vmem:[%s4155_s8 + $0x340] sm:$0xff]  ;;  %2422 = vmatpush.msra.mxu2 %v2318_v23  ;;  %v2361_v17 = vld [vmem:[%s4155_s8 + $0x3a8] sm:$0xff] }
 0x32d   : > { %v2254_v62 = vld [vmem:[%s4155_s8 + $0x50] sm:$0xff]  ;;  %2401 = vmatpush.msra.mxu1 %v2288_v22  ;;  %2442 = vmatpush.msra.mxu3 %v2350_v24  ;;  %v2252_v28 = vld [vmem:[%s4155_s8 + $0x40] sm:$0xff]  ;;  %v2327_v24 = vld [vmem:[%s4155_s8 + $0x298] sm:$0xff] }
 0x32e   : > { %v2286_v25 = vld [vmem:[%s4155_s8 + $0x150] sm:$0xff]  ;;  %v2284_v29 = vld [vmem:[%s4155_s8 + $0x140] sm:$0xff]  ;;  %2382 = vmatpush.msra.mxu0 %v2254_v62  ;;  %2423 = vmatpush.msra.mxu2 %v2316_v26  ;;  %v2265_v62 = vld [vmem:[%s4155_s8 + $0xa8] sm:$0xff] }
 0x32f   : > { %2402 = vmatpush.msra.mxu1 %v2286_v25  ;;  %v2314_v30 = vld [vmem:[%s4155_s8 + $0x230] sm:$0xff]  ;;  %2443 = vmatpush.msra.mxu3 %v2348_v27  ;;  %v2312_v53 = vld [vmem:[%s4155_s8 + $0x220] sm:$0xff] }
 0x330   : > { %v2346_v31 = vld [vmem:[%s4155_s8 + $0x330] sm:$0xff]  ;;  %2383 = vmatpush.msra.mxu0 %v2252_v28  ;;  %v2344_v33 = vld [vmem:[%s4155_s8 + $0x320] sm:$0xff]  ;;  %2424 = vmatpush.msra.mxu2 %v2314_v30  ;;  %v2359_v30 = vld [vmem:[%s4155_s8 + $0x398] sm:$0xff] }
 0x331   : > { %v2250_v43 = vld [vmem:[%s4155_s8 + $0x30] sm:$0xff]  ;;  %2403 = vmatpush.msra.mxu1 %v2284_v29  ;;  %2444 = vmatpush.msra.mxu3 %v2346_v31  ;;  %v2248_v34 = vld [vmem:[%s4155_s8 + $0x20] sm:$0xff]  ;;  %v2297_v29 = vld [vmem:[%s4155_s8 + $0x1a8] sm:$0xff] }
 0x332   : > { %v2282_v32 = vld [vmem:[%s4155_s8 + $0x130] sm:$0xff]  ;;  %v2280_v35 = vld [vmem:[%s4155_s8 + $0x120] sm:$0xff]  ;;  %2384 = vmatpush.msra.mxu0 %v2250_v43  ;;  %2425 = vmatpush.msra.mxu2 %v2312_v53  ;;  %v2325_v53 = vld [vmem:[%s4155_s8 + $0x288] sm:$0xff] }
 0x333   : > { %2404 = vmatpush.msra.mxu1 %v2282_v32  ;;  %v2310_v36 = vld [vmem:[%s4155_s8 + $0x210] sm:$0xff]  ;;  %2445 = vmatpush.msra.mxu3 %v2344_v33  ;;  %v2308_v39 = vld [vmem:[%s4155_s8 + $0x200] sm:$0xff]  ;;  %v2263_v33 = vld [vmem:[%s4155_s8 + $0x98] sm:$0xff] }
 0x334   : > { %v2342_v37 = vld [vmem:[%s4155_s8 + $0x310] sm:$0xff]  ;;  %2385 = vmatpush.msra.mxu0 %v2248_v34  ;;  %v2340_v40 = vld [vmem:[%s4155_s8 + $0x300] sm:$0xff]  ;;  %2426 = vmatpush.msra.mxu2 %v2310_v36 }
 0x335   : > { %v2246_v38 = vld [vmem:[%s4155_s8 + $0x10] sm:$0xff]  ;;  %2405 = vmatpush.msra.mxu1 %v2280_v35  ;;  %2446 = vmatpush.msra.mxu3 %v2342_v37  ;;  %v2244_v44 = vld [vmem:[%s4155_s8] sm:$0xff]  ;;  %v2295_v37 = vld [vmem:[%s4155_s8 + $0x198] sm:$0xff] }
 0x336   : > { %v2278_v57 = vld [vmem:[%s4155_s8 + $0x110] sm:$0xff]  ;;  %2386 = vmatpush.msra.mxu0 %v2246_v38  ;;  %v2276_v45 = vld [vmem:[%s4155_s8 + $0x100] sm:$0xff]  ;;  %2427 = vmatpush.msra.mxu2 %v2308_v39  ;;  %v2357_v38 = vld [vmem:[%s4155_s8 + $0x388] sm:$0xff] }
 0x337   : > { %2406 = vmatpush.msra.mxu1 %v2278_v57  ;;  %2447 = vmatpush.msra.mxu3 %v2340_v40  ;;  %v2153_v1 = vld [vmem:[#allocation3] sm:$0xff]  ;;  %v2155_v2 = vld [vmem:[#allocation3 + $0x8] sm:$0xff]  ;;  %v2152_v19 = vld [vmem:[#allocation3 + $0x10] sm:$0xff] }
 0x338   : > { %2492 = vmatpush.msrb.mxu2 %v2339_v41  ;;  %2387 = vmatpush.msra.mxu0 %v2244_v44  ;;  %v2166_v3 = vld [vmem:[%s4149_s24] ss:$2 sm:$0xf]  ;;  %v3323_v4 = vrot.slane %v2155_v2, 10  ;;  %v3325_v8 = vrot.slane %v2153_v1, 10  ;;  %v3324_v28 = vrot.slane %v2152_v19, 10 }
 0x339   : > { %2512 = vmatpush.msrb.mxu3 %v2371_v42  ;;  %2407 = vmatpush.msra.mxu1 %v2276_v45  ;;  %v2170_v5 = vperm.slane %v2166_v3, 2  ;;  %v2171_v6 = vperm.slane %v2166_v3, 3  ;;  %v3326_v58 = vld [vmem:[%s4149_s24 + $0x1] ss:$2 sm:$0xf]  ;;  %v2168_v15 = vperm.slane %v2166_v3, 0 }
 0x33a   : > { %2493 = vmatpush.msrb.mxu2 %v2337_v46  ;;  %2452 = vmatpush.msrb.mxu0 %v2275_v48  ;;  %v2197_v9 = vperm.slane %v3326_v58, 2  ;;  %v2198_v10 = vperm.slane %v3326_v58, 3  ;;  %v2165_v13 = vsub.f32 %v2153_v1, %v3323_v4  ;;  %v2169_v16 = vperm.slane %v2166_v3, 1  ;;  %v2154_v20 = vld [vmem:[#allocation3 + $0x18] sm:$0xff]  ;;  %v2261_v41 = vld [vmem:[%s4155_s8 + $0x88] sm:$0xff] }
 0x33b   : > { %2472 = vmatpush.msrb.mxu1 %v2307_v49  ;;  %2513 = vmatpush.msrb.mxu3 %v2369_v47  ;;  %v2173_v14 = vrot.slane %v2171_v6, 4  ;;  %v2195_v22 = vperm.slane %v3326_v58, 0  ;;  %v2196_v23 = vperm.slane %v3326_v58, 1  ;;  %v3322_v26 = vrot.slane %v2154_v20, 10  ;;  %v2323_v40 = vld [vmem:[%s4155_s8 + $0x278] sm:$0xff]  ;;  %v2293_v45 = vld [vmem:[%s4155_s8 + $0x188] sm:$0xff] }
 0x33c   : > { %2494 = vmatpush.msrb.mxu2 %v2335_v50  ;;  %2453 = vmatpush.msrb.mxu0 %v2273_v54  ;;  %v2200_v18 = vrot.slane %v2198_v10, 4  ;;  %v2172_v27 = vrot.slane %v2169_v16, 4  ;;  %v2191_v43 = vadd.f32 %v3325_v8, %v2155_v2  ;;  %v2190_v39 = vadd.f32 %v3324_v28, %v2154_v20  ;;  %v2355_v46 = vld [vmem:[%s4155_s8 + $0x378] sm:$0xff]  ;;  %v2321_v49 = vld [vmem:[%s4155_s8 + $0x268] sm:$0xff] }
 0x33d   : > { %2473 = vmatpush.msrb.mxu1 %v2305_v51  ;;  %2514 = vmatpush.msrb.mxu3 %v2367_v56  ;;  %v2175_v25 = vsel %vm2131_vm5, %v2170_v5, %v2173_v14  ;;  %v2199_v32 = vrot.slane %v2196_v23, 4  ;;  %v2164_v35 = vsub.f32 %v2152_v19, %v3322_v26  ;;  %v2259_v50 = vld [vmem:[%s4155_s8 + $0x78] sm:$0xff]  ;;  %v2353_v51 = vld [vmem:[%s4155_s8 + $0x368] sm:$0xff] }
 0x33e   : > { %2495 = vmatpush.msrb.mxu2 %v2333_v55  ;;  %2454 = vmatpush.msrb.mxu0 %v2271_v59  ;;  %v2179_v31 = vadd.f32 %v2175_v25, %v2165_v13  ;;  %v2202_v34 = vsel %vm2131_vm5, %v2197_v9, %v2200_v18  ;;  %v2174_v36 = vsel %vm2131_vm5, %v2168_v15, %v2172_v27  ;;  %v2291_v54 = vld [vmem:[%s4155_s8 + $0x178] sm:$0xff]  ;;  %v2257_v59 = vld [vmem:[%s4155_s8 + $0x68] sm:$0xff] }
 0x33f   : > { %2474 = vmatpush.msrb.mxu1 %v2303_v60  ;;  %2515 = vmatpush.msrb.mxu3 %v2365_v63  ;;  %v2178_v42 = vadd.f32 %v2174_v36, %v2164_v35  ;;  %v2201_v44 = vsel %vm2131_vm5, %v2195_v22, %v2199_v32  ;;  %v2206_v48 = vadd.f32 %v2202_v34, %v2191_v43  ;;  %v2319_v56 = vld [vmem:[%s4155_s8 + $0x258] sm:$0xff]  ;;  %v2289_v60 = vld [vmem:[%s4155_s8 + $0x168] sm:$0xff] }
 0x340   : > { %2496 = vmatpush.msrb.mxu2 %v2331_v61  ;;  %2455 = vmatpush.msrb.mxu0 %v2269_v0  ;;  %v2181_v57 = vmax.f32 %v2179_v31, 0.0  ;;  %v2205_v55 = vadd.f32 %v2201_v44, %v2190_v39  ;;  %v2351_v61 = vld [vmem:[%s4155_s8 + $0x358] sm:$0xff]  ;;  %v2317_v0 = vld [vmem:[%s4155_s8 + $0x248] sm:$0xff] }
 0x341   : > { %2475 = vmatpush.msrb.mxu1 %v2301_v7  ;;  %2516 = vmatpush.msrb.mxu3 %v2363_v21  ;;  %v2180_v47 = vmax.f32 %v2178_v42, 0.0  ;;  %v2208_v63 = vmax.f32 %v2206_v48, 0.0  ;;  %v2255_v1 = vld [vmem:[%s4155_s8 + $0x58] sm:$0xff]  ;;  %v2349_v4 = vld [vmem:[%s4155_s8 + $0x348] sm:$0xff] }
 0x342   : > { %2497 = vmatpush.msrb.mxu2 %v2329_v11  ;;  %2456 = vmatpush.msrb.mxu0 %v2267_v12  ;;  %2213 = vst [vmem:[#allocation1 + $0x10] ss:$2 sm:$0xff] %v2181_v57  ;;  %v2287_v2 = vld [vmem:[%s4155_s8 + $0x158] sm:$0xff]  ;;  %v2253_v5 = vld [vmem:[%s4155_s8 + $0x48] sm:$0xff]  ;;  %v2207_v6 = vmax.f32 %v2205_v55, 0.0 }
 0x343   : > { %2476 = vmatpush.msrb.mxu1 %v2299_v52  ;;  %2517 = vmatpush.msrb.mxu3 %v2361_v17  ;;  %2211 = vst [vmem:[#allocation1] ss:$2 sm:$0xff] %v2180_v47  ;;  %v2315_v3 = vld [vmem:[%s4155_s8 + $0x238] sm:$0xff]  ;;  %v2285_v21 = vld [vmem:[%s4155_s8 + $0x148] sm:$0xff] }
 0x344   : > { %2498 = vmatpush.msrb.mxu2 %v2327_v24  ;;  %2457 = vmatpush.msrb.mxu0 %v2265_v62  ;;  %v2313_v8 = vld [vmem:[%s4155_s8 + $0x228] sm:$0xff]  ;;  %v2347_v9 = vld [vmem:[%s4155_s8 + $0x338] sm:$0xff] }
 0x345   : > { %2477 = vmatpush.msrb.mxu1 %v2297_v29  ;;  %2518 = vmatpush.msrb.mxu3 %v2359_v30  ;;  %v2251_v10 = vld [vmem:[%s4155_s8 + $0x38] sm:$0xff]  ;;  %v2345_v12 = vld [vmem:[%s4155_s8 + $0x328] sm:$0xff] }
 0x346   : > { %2499 = vmatpush.msrb.mxu2 %v2325_v53  ;;  %2458 = vmatpush.msrb.mxu0 %v2263_v33  ;;  %v2283_v11 = vld [vmem:[%s4155_s8 + $0x138] sm:$0xff]  ;;  %v2249_v15 = vld [vmem:[%s4155_s8 + $0x28] sm:$0xff] }
 0x347   : > { %2478 = vmatpush.msrb.mxu1 %v2295_v37  ;;  %2519 = vmatpush.msrb.mxu3 %v2357_v38  ;;  %v2311_v14 = vld [vmem:[%s4155_s8 + $0x218] sm:$0xff]  ;;  %v2281_v16 = vld [vmem:[%s4155_s8 + $0x128] sm:$0xff] }
 0x348   : > { %2500 = vmatpush.msrb.mxu2 %v2323_v40  ;;  %2459 = vmatpush.msrb.mxu0 %v2261_v41  ;;  %v2343_v17 = vld [vmem:[%s4155_s8 + $0x318] sm:$0xff]  ;;  %v2309_v18 = vld [vmem:[%s4155_s8 + $0x208] sm:$0xff] }
 0x349   : > { %2479 = vmatpush.msrb.mxu1 %v2293_v45  ;;  %2520 = vmatpush.msrb.mxu3 %v2355_v46  ;;  %v2216_v58 = vld.sshfl [vmem:[#allocation1 + $0x10] sm:$0xff pattern:$0x75316420]  ;;  %v2217_v7 = vld.sshfl [vmem:[#allocation1 + $0x18] sm:$0xff pattern:$0x75316420] }
 0x34a   : > { %2501 = vmatpush.msrb.mxu2 %v2321_v49  ;;  %2460 = vmatpush.msrb.mxu0 %v2259_v50  ;;  %2226 = vst [vmem:[#allocation1 + $0x10] ss:$2 sm:$0xff] %v2208_v63  ;;  %v2214_v52 = vld.sshfl [vmem:[#allocation1] sm:$0xff pattern:$0x75316420]  ;;  %v2341_v22 = vld [vmem:[%s4155_s8 + $0x308] sm:$0xff] }
 0x34b   : > { %2480 = vmatpush.msrb.mxu1 %v2291_v54  ;;  %2521 = vmatpush.msrb.mxu3 %v2353_v51  ;;  %v2215_v13 = vld.sshfl [vmem:[#allocation1 + $0x8] sm:$0xff pattern:$0x75316420]  ;;  %v2247_v19 = vld [vmem:[%s4155_s8 + $0x18] sm:$0xff] }
 0x34c   : > { %2502 = vmatpush.msrb.mxu2 %v2319_v56  ;;  %2461 = vmatpush.msrb.mxu0 %v2257_v59  ;;  %2224 = vst [vmem:[#allocation1] ss:$2 sm:$0xff] %v2207_v6  ;;  %v2279_v20 = vld [vmem:[%s4155_s8 + $0x118] sm:$0xff]  ;;  %v2245_v23 = vld [vmem:[%s4155_s8 + $0x8] sm:$0xff] }
 0x34d   : > { %2481 = vmatpush.msrb.mxu1 %v2289_v60  ;;  %2522 = vmatpush.msrb.mxu3 %v2351_v61  ;;  %v2277_v27 = vld [vmem:[%s4155_s8 + $0x108] sm:$0xff] }
 0x34e   : > { %2503 = vmatpush.msrb.mxu2 %v2317_v0  ;;  %2462 = vmatpush.msrb.mxu0 %v2255_v1 }
 0x34f   : > { %2482 = vmatpush.msrb.mxu1 %v2287_v2  ;;  %2523 = vmatpush.msrb.mxu3 %v2349_v4 }
 0x350   : > { %2504 = vmatpush.msrb.mxu2 %v2315_v3  ;;  %2463 = vmatpush.msrb.mxu0 %v2253_v5 }
 0x351   : > { %2483 = vmatpush.msrb.mxu1 %v2285_v21  ;;  %2524 = vmatpush.msrb.mxu3 %v2347_v9  ;;  %v2229_v24 = vld.sshfl [vmem:[#allocation1 + $0x10] sm:$0xff pattern:$0x75316420]  ;;  %v2230_v62 = vld.sshfl [vmem:[#allocation1 + $0x18] sm:$0xff pattern:$0x75316420] }
 0x352   : > { %2505 = vmatpush.msrb.mxu2 %v2313_v8  ;;  %2464 = vmatpush.msrb.mxu0 %v2251_v10  ;;  %v2233_v25 = vrot.slane %v2229_v24, 6  ;;  %v2234_v26 = vrot.slane %v2230_v62, 6 }
 0x353   : > { %2484 = vmatpush.msrb.mxu1 %v2283_v11  ;;  %2525 = vmatpush.msrb.mxu3 %v2345_v12  ;;  %v2227_v30 = vld.sshfl [vmem:[#allocation1] sm:$0xff pattern:$0x75316420]  ;;  %v2228_v31 = vld.sshfl [vmem:[#allocation1 + $0x8] sm:$0xff pattern:$0x75316420] }
 0x354   : > { %2506 = vmatpush.msrb.mxu2 %v2311_v14  ;;  %2465 = vmatpush.msrb.mxu0 %v2249_v15  ;;  %v2242_v28 = vsel %vm2239_vm6, %v2216_v58, %v2233_v25  ;;  %v2243_v29 = vsel %vm2239_vm6, %v2217_v7, %v2234_v26  ;;  %v2231_v43 = vrot.slane %v2227_v30, 6  ;;  %v2232_v32 = vrot.slane %v2228_v31, 6 }
 0x355   : > { %2485 = vmatpush.msrb.mxu1 %v2281_v16  ;;  %2526 = vmatpush.msrb.mxu3 %v2343_v17 }
 0x356   : > { %2507 = vmatpush.msrb.mxu2 %v2309_v18  ;;  %2466 = vmatpush.msrb.mxu0 %v2247_v19  ;;  %v2240_v53 = vsel %vm2239_vm6, %v2214_v52, %v2231_v43  ;;  %v2241_v33 = vsel %vm2239_vm6, %v2215_v13, %v2232_v32 }
 0x357   : > { %2486 = vmatpush.msrb.mxu1 %v2279_v20  ;;  %2527 = vmatpush.msrb.mxu3 %v2341_v22 }
 0x358   : > { %2467 = vmatpush.msrb.mxu0 %v2245_v23  ;;  %2428 = vmatmul.f32.vlgmr.msra.gmra.mxu2 %v2242_v28 }
 0x359   : > { %2448 = vmatmul.f32.vlgmr.msra.gmra.mxu3 %v2243_v29  ;;  %2487 = vmatpush.msrb.mxu1 %v2277_v27 }
 0x35a   : > { %2388 = vmatmul.f32.vlgmr.msra.gmra.mxu0 %v2240_v53  ;;  %2408 = vmatmul.f32.vlgmr.msra.gmra.mxu1 %v2241_v33 }
 0x360   : > { %2508 = vmatmul.f32.vlgmr.msrb.gmra.mxu2 %v2242_v28 }
 0x361   : > { %2528 = vmatmul.f32.vlgmr.msrb.gmra.mxu3 %v2243_v29 }
 0x362   : > { %2468 = vmatmul.f32.vlgmr.msrb.gmra.mxu0 %v2240_v53  ;;  %2488 = vmatmul.f32.vlgmr.msrb.gmra.mxu1 %v2241_v33 }
 0x3d7   : > { %v2389_v34 = vpop.f32.mrf.mxu0  ;;  %v2409_v35 = vpop.f32.mrf.mxu1 }
 0x3d8   : > { %v2410_v38 = vadd.f32 %v2409_v35, %v2389_v34 }
 0x3db   : > { %v2429_v36 = vpop.f32.mrf.mxu2 }
 0x3dc   : > { %v2449_v37 = vpop.f32.mrf.mxu3  ;;  %v2430_v44 = vadd.f32 %v2429_v36, %v2410_v38 }
 0x3de   : > { %v2450_v48 = vadd.f32 %v2449_v37, %v2430_v44 }
 0x3df   : > { %v2469_v57 = vpop.f32.mrf.mxu0  ;;  %v2489_v39 = vpop.f32.mrf.mxu1 }
 0x3e0   : > { %v2490_v40 = vadd.f32 %v2489_v39, %v2469_v57 }
 0x3e3   : > { %v2509_v41 = vpop.f32.mrf.mxu2 }
 0x3e4   : > { %v2529_v42 = vpop.f32.mrf.mxu3  ;;  %v2510_v45 = vadd.f32 %v2509_v41, %v2490_v40 }
 0x3e6   : > { %v2530_v46 = vadd.f32 %v2529_v42, %v2510_v45 }
 0x3e8   : > { %v2534_v49 = vrot.slane %v2530_v46, 4 }
 0x3ea   : > { %v2535_v50 = vsel %vm2131_vm5, %v2450_v48, %v2534_v49 }
 0x3eb   : > { %2537 = vst [vmem:[%s4166_s1] sm:$0xff] %v2535_v50 }
 0x3ec PF: > { %s25_s11 = sadd.s32 1, %s3911_s11   ;;  %s5100_s27 = sld [smem:[#allocation19_spill]] }
 0x3ed   : > { %p22_p7 = scmp.ge.s32.totalorder %s25_s11, 18   ;;  %s5101_s13 = sld [smem:[#allocation24_spill]] }
 0x3ee   : > { %s5102_s19 = sld [smem:[#allocation25_spill]]  ;;  %s5103_s24 = smov %s3875_s25 }
 0x3ef   : > { %s5104_s25 = smov %s3879_s26  ;;  %s5105_s26 = smov %s4112_s15 }
 0x3f0   : > { %s5106_s28 = smov %s3891_s29  ;;  %s5107_s29 = smov %s4082_s0 }
 0x3f1   : > { %s5108_s30 = smov %s3903_s9  ;;  %s5109_s8 = smov %s3907_s10 }
 0x3f2   :  { %24 = sbr.rel (!%p22_p7) target bundleno = 17 (0x11), region = 138 }
 0x3f3   : > { %s5110_s9 = smov %s5101_s13 }
 0x3f4   : > { %s5111_s10 = smov %s5102_s19 }
 0x3f7   :  { %2559 = vsyncpa [#allocation5], 1 }
 0x3f8   :  { %2561 = vsyncpa [#allocation5 + $0x1], 1 }
 0x3f9   :  { %2562 = vsyncpa [#allocation7], 1 }
 0x3fa   :  { %2563 = vsyncpa [#allocation10], 1 }
 0x3fb   :  { %2565 = vsyncpa [#allocation10 + $0x1], 1 }
 0x3fc   :  { %2566 = vsyncpa [#allocation13], 1 }
 0x3fd   :  { %2568 = vsyncpa [#allocation13 + $0x1], 1 }

</bundles_post_ra>
